<compile_context>
chip_gen: v7x
topology: tpu7x:2x2x1
jax: 0.10.0
libtpu: 0.0.40
codegen_flags: <defaults>
</compile_context>

<pallas_src>
import functools

import jax
import jax.numpy as jnp
from jax.experimental import pallas as pl
from jax.experimental.pallas import tpu as pltpu


# ---------------------------------------------------------------------------
# In-kernel helpers (only lane concat / lane slice / elementwise / 2-D dot)
# ---------------------------------------------------------------------------
def _shift_lanes(x, d, size):
    """y[:, p] = x[:, p + d], zero-filled where p + d falls outside [0, size)."""
    if d == 0:
        return x
    zeros = jnp.zeros((x.shape[0], abs(d)), x.dtype)
    if d > 0:
        return jnp.concatenate([x[:, d:], zeros], axis=1)
    return jnp.concatenate([zeros, x[:, :size + d]], axis=1)


def _conv3x3(x, w_ref, b_ref, H, W, negative_slope):
    """3x3 'same' conv (cross-correlation, pad=1) on a channels-major flat image.

    x: (Cin, H*W) f32, w_ref: (9, Cout, Cin) ref (tap-major ky*3+kx), b_ref: (Cout, 1) ref.
    Returns (Cout, H*W) f32.  Column-boundary taps are masked with a col-index mask; row
    boundary taps fall off the flat array and are zero-filled by _shift_lanes.
    """
    S = H * W
    Cout = w_ref.shape[1]
    # col[0, p] = p % W, built with lane concatenation (no vector integer div needed).
    col = jnp.concatenate(
        [jax.lax.broadcasted_iota(jnp.int32, (1, W), 1)] * H, axis=1)       # (1, S)
    acc = jnp.zeros((Cout, S), jnp.float32)
    tap = 0
    for oy in (-1, 0, 1):
        for ox in (-1, 0, 1):
            shifted = _shift_lanes(x, oy * W + ox, S)                        # (Cin, S)
            if ox != 0:
                keep = jnp.logical_and(col + ox >= 0, col + ox <= W - 1)     # (1, S)
                shifted = jnp.where(keep, shifted, 0.0)
            acc = acc + jnp.dot(w_ref[tap], shifted,
                                preferred_element_type=jnp.float32)
            tap += 1
    acc = acc + b_ref[...]                                                   # (Cout,1) bcast
    if negative_slope is not None:                                           # LeakyReLU(0.2)
        acc = jnp.where(acc >= 0, acc, negative_slope * acc)
    return acc


def _maxpool2x2(x, p_sel, W):
    """MaxPool2d(2,2): horizontal + vertical pair maxes, then exact 0/1 compaction dot.

    x: (Cin, H*W) f32; p_sel: (H*W, (H//2)*(W//2)) 0/1.  Only even-row/even-col positions
    of the pair-max image are selected, so garbage at odd positions never propagates.
    """
    S = x.shape[1]
    mh = jnp.maximum(x, _shift_lanes(x, 1, S))
    mv = jnp.maximum(mh, _shift_lanes(mh, W, S))
    return jnp.dot(mv, p_sel, preferred_element_type=jnp.float32)


# ---------------------------------------------------------------------------
# Single fused kernel: full encoder + decoder for one batch element
# ---------------------------------------------------------------------------
def _sln_ae_kernel(*refs, H, W, depth, conv_repeats):
    x_ref, in_w, in_b, sw, sb, out_w, out_b = refs[:7]
    sel = refs[7:7 + 2 * depth]
    o_ref = refs[7 + 2 * depth]
    pools, ups = sel[:depth], sel[depth:]

    y = x_ref[0].astype(jnp.float32)                     # (Cin, H*W)
    h, w = H, W
    count = 0

    # encoder: (maxpool -> conv_block) per level.  PyTorch applies the conv to the
    # *pooled* tensor conv_repeats[count] times WITHOUT chaining, so repeats > 1 produce
    # the identical value -> one application is semantically equivalent.
    for i in range(depth):
        pooled = _maxpool2x2(y, pools[i][...], w)        # (Cin, (h//2)*(w//2))
        h, w = h // 2, w // 2
        if i == 0:
            y = _conv3x3(pooled, in_w, in_b, h, w, 0.2)
        else:
            y = _conv3x3(pooled, sw, sb, h, w, 0.2)
        count += 1

    # decoder: (nearest-upsample 2x -> conv(s)) per level
    out = None
    for i in range(depth):
        up = jnp.dot(y, ups[i][...], preferred_element_type=jnp.float32)    # (C, 4*h*w)
        h, w = 2 * h, 2 * w
        if i == depth - 1:
            # out_conv: no activation; repeats are not chained -> one application.
            out = _conv3x3(up, out_w, out_b, h, w, None)
        else:
            y = _conv3x3(up, sw, sb, h, w, 0.2)
            for _ in range(conv_repeats[count] - 1):     # chained super_block repeats
                y = _conv3x3(y, sw, sb, h, w, 0.2)
        count += 1

    o_ref[0] = out.astype(o_ref.dtype)


# ---------------------------------------------------------------------------
# Shape-only selection matrices (constant under jit; VMEM-resident across grid steps)
# ---------------------------------------------------------------------------
def _pool_select(H, W, dtype):
    """(H*W, Ho*Wo) 0/1 matrix: column q picks flat index 2*(q//Wo)*W + 2*(q%Wo)."""
    Ho, Wo = H // 2, W // 2
    p = jnp.arange(H * W)[:, None]
    q = jnp.arange(Ho * Wo)[None, :]
    src = 2 * (q // Wo) * W + 2 * (q % Wo)
    return (p == src).astype(dtype)


def _up_select(H, W, dtype):
    """(H*W, 4*H*W) 0/1 matrix: output col p copies the nearest-neighbor input index."""
    q = jnp.arange(H * W)[:, None]
    p = jnp.arange(4 * H * W)[None, :]
    src = (p // (2 * W) // 2) * W + (p % (2 * W)) // 2
    return (q == src).astype(dtype)


def _flat_weights(w, b):
    # (Cout, Cin, 3, 3) -> (9, Cout, Cin) tap-major (tap = ky*3 + kx); bias -> (Cout, 1).
    Cout, Cin = w.shape[0], w.shape[1]
    w9 = jnp.transpose(w, (2, 3, 0, 1)).reshape(9, Cout, Cin)
    return w9, b.reshape(Cout, 1)


# ---------------------------------------------------------------------------
# SLN_AE forward (same semantics as the PyTorch module's forward)
# ---------------------------------------------------------------------------
def sln_ae_forward(x_nchw, params, depth, conv_repeats):
    N, Cin, H, W = x_nchw.shape
    assert H % (2 ** depth) == 0 and W % (2 ** depth) == 0, \
        "fused kernel requires H, W divisible by 2**depth"
    S = H * W
    x = x_nchw.reshape(N, Cin, S)                        # NCHW -> (N, C, H*W), free reshape

    in_w9, in_b2 = _flat_weights(params["in_w"], params["in_b"])
    sw9, sb2 = _flat_weights(params["W"], params["b"])
    out_w9, out_b2 = _flat_weights(params["out_w"], params["out_b"])
    out_ch = out_w9.shape[1]

    pool_mats, up_mats = [], []
    h, w = H, W
    for _ in range(depth):
        pool_mats.append(_pool_select(h, w, jnp.float32))
        h, w = h // 2, w // 2
    for _ in range(depth):
        up_mats.append(_up_select(h, w, jnp.float32))
        h, w = 2 * h, 2 * w

    kern = functools.partial(_sln_ae_kernel, H=H, W=W, depth=depth,
                             conv_repeats=tuple(conv_repeats))

    in_specs = [
        pl.BlockSpec((1, Cin, S), lambda n: (n, 0, 0)),
        pl.BlockSpec(in_w9.shape, lambda n: (0, 0, 0)),
        pl.BlockSpec(in_b2.shape, lambda n: (0, 0)),
        pl.BlockSpec(sw9.shape, lambda n: (0, 0, 0)),
        pl.BlockSpec(sb2.shape, lambda n: (0, 0)),
        pl.BlockSpec(out_w9.shape, lambda n: (0, 0, 0)),
        pl.BlockSpec(out_b2.shape, lambda n: (0, 0)),
    ]
    for m in pool_mats + up_mats:
        in_specs.append(pl.BlockSpec(m.shape, lambda n: (0, 0)))

    out = pl.pallas_call(
        kern,
        out_shape=jax.ShapeDtypeStruct((N, out_ch, S), x.dtype),
        grid=(N,),
        in_specs=in_specs,
        out_specs=pl.BlockSpec((1, out_ch, S), lambda n: (n, 0, 0)),
        compiler_params=pltpu.CompilerParams(dimension_semantics=("parallel",)),
    )(x, in_w9, in_b2, sw9, sb2, out_w9, out_b2, *pool_mats, *up_mats)
    return out.reshape(N, out_ch, H, W)


# ---------------------------------------------------------------------------
# Pure-JAX reference (mirrors the PyTorch forward exactly) for numerical check
# ---------------------------------------------------------------------------
def _ref_conv(x, w, b, negative_slope):
    out = jax.lax.conv_general_dilated(
        x, jnp.transpose(w, (2, 3, 1, 0)), (1, 1), "SAME",
        dimension_numbers=("NHWC", "HWIO", "NHWC"))
    out = out + b
    if negative_slope is not None:
        out = jnp.where(out >= 0, out, negative_slope * out)
    return out


def _ref_pool(x):
    return jax.lax.reduce_window(x, -jnp.inf, jax.lax.max,
                                 (1, 2, 2, 1), (1, 2, 2, 1), "VALID")


def _ref_up(x):
    return jnp.repeat(jnp.repeat(x, 2, axis=1), 2, axis=2)


def sln_ae_reference(x_nchw, params, depth, conv_repeats):
    x = jnp.transpose(x_nchw, (0, 2, 3, 1))              # NCHW -> NHWC
    x_enc = [x]
    count = 0
    for i in range(depth):
        xenc = _ref_pool(x_enc[-1])
        xc = None
        for _ in range(conv_repeats[count]):
            if i == 0:
                xc = _ref_conv(xenc, params["in_w"], params["in_b"], 0.2)
            else:
                xc = _ref_conv(xenc, params["W"], params["b"], 0.2)
        x_enc.append(xc)
        count += 1
    y = x_enc[-1]
    out = None
    for i in range(depth):
        y = _ref_up(y)
        for _ in range(conv_repeats[count]):
            if i == depth - 1:
                out = _ref_conv(y, params["out_w"], params["out_b"], None)
            else:
                y = _ref_conv(y, params["W"], params["b"], 0.2)
        count += 1
    return jnp.transpose(out, (0, 3, 1, 2))              # NHWC -> NCHW


# ---------------------------------------------------------------------------
# Deterministic synthetic parameters (shapes from the module's __init__)
# ---------------------------------------------------------------------------
def init_params(input_ch, out_ch, superblock_size, key):
    S = superblock_size
    k1, k2, k3, k4, k5 = jax.random.split(key, 5)
    return {
        # self.W = Normal(0, 1e-5).sample((S, S, 3, 3)); self.b = zeros(S)
        "W": 1e-5 * jax.random.normal(k1, (S, S, 3, 3), jnp.float32),
        "b": jnp.zeros((S,), jnp.float32),
        # in_conv: Conv2d(input_ch, S, 3, padding=1) + LeakyReLU(0.2)
        "in_w": 0.1 * jax.random.normal(k2, (S, input_ch, 3, 3), jnp.float32),
        "in_b": 0.01 * jax.random.normal(k3, (S,), jnp.float32),
        # out_conv: Conv2d(S, out_ch, 3, padding=1), no activation
        "out_w": 0.1 * jax.random.normal(k4, (out_ch, S, 3, 3), jnp.float32),
        "out_b": 0.01 * jax.random.normal(k5, (out_ch,), jnp.float32),
    }


if __name__ == "__main__":
    input_ch, out_ch, superblock_size, depth = 4, 3, 8, 2
    conv_repeats = [1] * (2 * depth)                     # default conv_num=None
    N, H, W = 2, 16, 16

    key = jax.random.PRNGKey(0)
    kx, kp = jax.random.split(key)
    params = init_params(input_ch, out_ch, superblock_size, kp)
    x = jax.random.normal(kx, (N, input_ch, H, W), jnp.float32)

    fwd = jax.jit(functools.partial(sln_ae_forward, depth=depth, conv_repeats=conv_repeats))
    out = jax.block_until_ready(fwd(x, params))
    assert out.shape == (N, out_ch, H, W), out.shape

    ref = jax.block_until_ready(sln_ae_reference(x, params, depth, conv_repeats))
    max_err = float(jnp.max(jnp.abs(out - ref)))
    scale = float(jnp.max(jnp.abs(ref))) + 1e-30
    assert max_err <= 5e-2 * scale, (max_err, scale)

    print("KERNEL_OK")
</pallas_src>

<mosaic_0001>
module attributes {stable_mosaic.version = 11 : i64} {
  func.func @_sln_ae_kernel(%arg0: i32, %arg1: memref<1x4x256xf32, #tpu.memory_space<vmem>>, %arg2: memref<9x8x4xf32, #tpu.memory_space<vmem>>, %arg3: memref<8x1xf32, #tpu.memory_space<vmem>>, %arg4: memref<9x8x8xf32, #tpu.memory_space<vmem>>, %arg5: memref<8x1xf32, #tpu.memory_space<vmem>>, %arg6: memref<9x3x8xf32, #tpu.memory_space<vmem>>, %arg7: memref<3x1xf32, #tpu.memory_space<vmem>>, %arg8: memref<256x64xf32, #tpu.memory_space<vmem>>, %arg9: memref<64x16xf32, #tpu.memory_space<vmem>>, %arg10: memref<16x64xf32, #tpu.memory_space<vmem>>, %arg11: memref<64x256xf32, #tpu.memory_space<vmem>>, %arg12: memref<1x3x256xf32, #tpu.memory_space<vmem>>) attributes {dimension_semantics = [#tpu.dimension_semantics<parallel>], iteration_bounds = array<i64: 2>, scalar_prefetch = 0 : i64, scratch_operands = 0 : i64, tpu.core_type = #tpu.core_type<tc>, window_params = [{transform_indices = @transform_0, window_bounds = array<i64: 1, 4, 256>}, {pipeline_mode = #tpu.pipeline_mode<synchronous>, transform_indices = @transform_1, window_bounds = array<i64: 9, 8, 4>}, {pipeline_mode = #tpu.pipeline_mode<synchronous>, transform_indices = @transform_2, window_bounds = array<i64: 8, 1>}, {pipeline_mode = #tpu.pipeline_mode<synchronous>, transform_indices = @transform_3, window_bounds = array<i64: 9, 8, 8>}, {pipeline_mode = #tpu.pipeline_mode<synchronous>, transform_indices = @transform_4, window_bounds = array<i64: 8, 1>}, {pipeline_mode = #tpu.pipeline_mode<synchronous>, transform_indices = @transform_5, window_bounds = array<i64: 9, 3, 8>}, {pipeline_mode = #tpu.pipeline_mode<synchronous>, transform_indices = @transform_6, window_bounds = array<i64: 3, 1>}, {pipeline_mode = #tpu.pipeline_mode<synchronous>, transform_indices = @transform_7, window_bounds = array<i64: 256, 64>}, {pipeline_mode = #tpu.pipeline_mode<synchronous>, transform_indices = @transform_8, window_bounds = array<i64: 64, 16>}, {pipeline_mode = #tpu.pipeline_mode<synchronous>, transform_indices = @transform_9, window_bounds = array<i64: 16, 64>}, {pipeline_mode = #tpu.pipeline_mode<synchronous>, transform_indices = @transform_10, window_bounds = array<i64: 64, 256>}, {transform_indices = @transform_11, window_bounds = array<i64: 1, 3, 256>}]} {
    %c0 = arith.constant 0 : index
    %c0_0 = arith.constant 0 : index
    %c0_1 = arith.constant 0 : index
    %0 = vector.load %arg1[%c0, %c0_0, %c0_1] : memref<1x4x256xf32, #tpu.memory_space<vmem>>, vector<1x4x256xf32>
    %1 = vector.shape_cast %0 : vector<1x4x256xf32> to vector<4x256xf32>
    %c0_2 = arith.constant 0 : index
    %c0_3 = arith.constant 0 : index
    %2 = vector.load %arg8[%c0_2, %c0_3] : memref<256x64xf32, #tpu.memory_space<vmem>>, vector<256x64xf32>
    %cst = arith.constant 0.000000e+00 : f32
    %3 = vector.broadcast %cst : f32 to vector<4x1xf32>
    %4 = vector.extract_strided_slice %1 {offsets = [0, 1], sizes = [4, 255], strides = [1, 1]} : vector<4x256xf32> to vector<4x255xf32>
    %5 = tpu.concatenate %4, %3 in 1 : vector<4x255xf32>, vector<4x1xf32> -> vector<4x256xf32>
    %6 = arith.maximumf %1, %5 : vector<4x256xf32>
    %cst_4 = arith.constant 0.000000e+00 : f32
    %7 = vector.broadcast %cst_4 : f32 to vector<4x16xf32>
    %8 = vector.extract_strided_slice %6 {offsets = [0, 16], sizes = [4, 240], strides = [1, 1]} : vector<4x256xf32> to vector<4x240xf32>
    %9 = tpu.concatenate %8, %7 in 1 : vector<4x240xf32>, vector<4x16xf32> -> vector<4x256xf32>
    %10 = arith.maximumf %6, %9 : vector<4x256xf32>
    %cst_5 = arith.constant dense<0.000000e+00> : vector<4x64xf32>
    %11 = tpu.matmul %10, %2, %cst_5 {dimension_numbers = #tpu.dot_dimension_numbers<[1], [0], [0], [1], [0, 0, 1, 1], [], []>} : vector<4x256xf32>, vector<256x64xf32>, vector<4x64xf32> -> vector<4x64xf32>
    %12 = tpu.iota {dimensions = array<i32: 1>} : vector<1x8xi32>
    %13 = tpu.concatenate %12, %12, %12, %12, %12, %12, %12, %12 in 1 : vector<1x8xi32>, vector<1x8xi32>, vector<1x8xi32>, vector<1x8xi32>, vector<1x8xi32>, vector<1x8xi32>, vector<1x8xi32>, vector<1x8xi32> -> vector<1x64xi32>
    %cst_6 = arith.constant 0.000000e+00 : f32
    %14 = vector.broadcast %cst_6 : f32 to vector<8x64xf32>
    %cst_7 = arith.constant 0.000000e+00 : f32
    %15 = vector.broadcast %cst_7 : f32 to vector<4x9xf32>
    %16 = vector.extract_strided_slice %11 {offsets = [0, 0], sizes = [4, 55], strides = [1, 1]} : vector<4x64xf32> to vector<4x55xf32>
    %17 = tpu.concatenate %15, %16 in 1 : vector<4x9xf32>, vector<4x55xf32> -> vector<4x64xf32>
    %c-1_i32 = arith.constant -1 : i32
    %18 = vector.broadcast %c-1_i32 : i32 to vector<1x64xi32>
    %19 = arith.addi %13, %18 : vector<1x64xi32>
    %c0_i32 = arith.constant 0 : i32
    %20 = vector.broadcast %c0_i32 : i32 to vector<1x64xi32>
    %21 = arith.cmpi sge, %19, %20 : vector<1x64xi32>
    %c-1_i32_8 = arith.constant -1 : i32
    %22 = vector.broadcast %c-1_i32_8 : i32 to vector<1x64xi32>
    %23 = arith.addi %13, %22 : vector<1x64xi32>
    %c7_i32 = arith.constant 7 : i32
    %24 = vector.broadcast %c7_i32 : i32 to vector<1x64xi32>
    %25 = arith.cmpi sle, %23, %24 : vector<1x64xi32>
    %26 = arith.andi %21, %25 : vector<1x64xi1>
    %cst_9 = arith.constant 0.000000e+00 : f32
    %27 = vector.shape_cast %26 : vector<1x64xi1> to vector<1x64xi1>
    %28 = vector.broadcast %27 : vector<1x64xi1> to vector<4x64xi1>
    %29 = vector.broadcast %cst_9 : f32 to vector<4x64xf32>
    %30 = arith.select %28, %17, %29 : vector<4x64xi1>, vector<4x64xf32>
    %c0_10 = arith.constant 0 : index
    %c0_11 = arith.constant 0 : index
    %c0_12 = arith.constant 0 : index
    %31 = vector.load %arg2[%c0_10, %c0_11, %c0_12] : memref<9x8x4xf32, #tpu.memory_space<vmem>>, vector<1x8x4xf32>
    %32 = vector.shape_cast %31 : vector<1x8x4xf32> to vector<8x4xf32>
    %cst_13 = arith.constant dense<0.000000e+00> : vector<8x64xf32>
    %33 = tpu.matmul %32, %30, %cst_13 {dimension_numbers = #tpu.dot_dimension_numbers<[1], [0], [0], [1], [0, 0, 1, 1], [], []>} : vector<8x4xf32>, vector<4x64xf32>, vector<8x64xf32> -> vector<8x64xf32>
    %34 = arith.addf %14, %33 : vector<8x64xf32>
    %cst_14 = arith.constant 0.000000e+00 : f32
    %35 = vector.broadcast %cst_14 : f32 to vector<4x8xf32>
    %36 = vector.extract_strided_slice %11 {offsets = [0, 0], sizes = [4, 56], strides = [1, 1]} : vector<4x64xf32> to vector<4x56xf32>
    %37 = tpu.concatenate %35, %36 in 1 : vector<4x8xf32>, vector<4x56xf32> -> vector<4x64xf32>
    %c1 = arith.constant 1 : index
    %c0_15 = arith.constant 0 : index
    %c0_16 = arith.constant 0 : index
    %38 = vector.load %arg2[%c1, %c0_15, %c0_16] : memref<9x8x4xf32, #tpu.memory_space<vmem>>, vector<1x8x4xf32>
    %39 = vector.shape_cast %38 : vector<1x8x4xf32> to vector<8x4xf32>
    %cst_17 = arith.constant dense<0.000000e+00> : vector<8x64xf32>
    %40 = tpu.matmul %39, %37, %cst_17 {dimension_numbers = #tpu.dot_dimension_numbers<[1], [0], [0], [1], [0, 0, 1, 1], [], []>} : vector<8x4xf32>, vector<4x64xf32>, vector<8x64xf32> -> vector<8x64xf32>
    %41 = arith.addf %34, %40 : vector<8x64xf32>
    %cst_18 = arith.constant 0.000000e+00 : f32
    %42 = vector.broadcast %cst_18 : f32 to vector<4x7xf32>
    %43 = vector.extract_strided_slice %11 {offsets = [0, 0], sizes = [4, 57], strides = [1, 1]} : vector<4x64xf32> to vector<4x57xf32>
    %44 = tpu.concatenate %42, %43 in 1 : vector<4x7xf32>, vector<4x57xf32> -> vector<4x64xf32>
    %c1_i32 = arith.constant 1 : i32
    %45 = vector.broadcast %c1_i32 : i32 to vector<1x64xi32>
    %46 = arith.addi %13, %45 : vector<1x64xi32>
    %c0_i32_19 = arith.constant 0 : i32
    %47 = vector.broadcast %c0_i32_19 : i32 to vector<1x64xi32>
    %48 = arith.cmpi sge, %46, %47 : vector<1x64xi32>
    %c1_i32_20 = arith.constant 1 : i32
    %49 = vector.broadcast %c1_i32_20 : i32 to vector<1x64xi32>
    %50 = arith.addi %13, %49 : vector<1x64xi32>
    %c7_i32_21 = arith.constant 7 : i32
    %51 = vector.broadcast %c7_i32_21 : i32 to vector<1x64xi32>
    %52 = arith.cmpi sle, %50, %51 : vector<1x64xi32>
    %53 = arith.andi %48, %52 : vector<1x64xi1>
    %cst_22 = arith.constant 0.000000e+00 : f32
    %54 = vector.shape_cast %53 : vector<1x64xi1> to vector<1x64xi1>
    %55 = vector.broadcast %54 : vector<1x64xi1> to vector<4x64xi1>
    %56 = vector.broadcast %cst_22 : f32 to vector<4x64xf32>
    %57 = arith.select %55, %44, %56 : vector<4x64xi1>, vector<4x64xf32>
    %c2 = arith.constant 2 : index
    %c0_23 = arith.constant 0 : index
    %c0_24 = arith.constant 0 : index
    %58 = vector.load %arg2[%c2, %c0_23, %c0_24] : memref<9x8x4xf32, #tpu.memory_space<vmem>>, vector<1x8x4xf32>
    %59 = vector.shape_cast %58 : vector<1x8x4xf32> to vector<8x4xf32>
    %cst_25 = arith.constant dense<0.000000e+00> : vector<8x64xf32>
    %60 = tpu.matmul %59, %57, %cst_25 {dimension_numbers = #tpu.dot_dimension_numbers<[1], [0], [0], [1], [0, 0, 1, 1], [], []>} : vector<8x4xf32>, vector<4x64xf32>, vector<8x64xf32> -> vector<8x64xf32>
    %61 = arith.addf %41, %60 : vector<8x64xf32>
    %cst_26 = arith.constant 0.000000e+00 : f32
    %62 = vector.broadcast %cst_26 : f32 to vector<4x1xf32>
    %63 = vector.extract_strided_slice %11 {offsets = [0, 0], sizes = [4, 63], strides = [1, 1]} : vector<4x64xf32> to vector<4x63xf32>
    %64 = tpu.concatenate %62, %63 in 1 : vector<4x1xf32>, vector<4x63xf32> -> vector<4x64xf32>
    %c-1_i32_27 = arith.constant -1 : i32
    %65 = vector.broadcast %c-1_i32_27 : i32 to vector<1x64xi32>
    %66 = arith.addi %13, %65 : vector<1x64xi32>
    %c0_i32_28 = arith.constant 0 : i32
    %67 = vector.broadcast %c0_i32_28 : i32 to vector<1x64xi32>
    %68 = arith.cmpi sge, %66, %67 : vector<1x64xi32>
    %c-1_i32_29 = arith.constant -1 : i32
    %69 = vector.broadcast %c-1_i32_29 : i32 to vector<1x64xi32>
    %70 = arith.addi %13, %69 : vector<1x64xi32>
    %c7_i32_30 = arith.constant 7 : i32
    %71 = vector.broadcast %c7_i32_30 : i32 to vector<1x64xi32>
    %72 = arith.cmpi sle, %70, %71 : vector<1x64xi32>
    %73 = arith.andi %68, %72 : vector<1x64xi1>
    %cst_31 = arith.constant 0.000000e+00 : f32
    %74 = vector.shape_cast %73 : vector<1x64xi1> to vector<1x64xi1>
    %75 = vector.broadcast %74 : vector<1x64xi1> to vector<4x64xi1>
    %76 = vector.broadcast %cst_31 : f32 to vector<4x64xf32>
    %77 = arith.select %75, %64, %76 : vector<4x64xi1>, vector<4x64xf32>
    %c3 = arith.constant 3 : index
    %c0_32 = arith.constant 0 : index
    %c0_33 = arith.constant 0 : index
    %78 = vector.load %arg2[%c3, %c0_32, %c0_33] : memref<9x8x4xf32, #tpu.memory_space<vmem>>, vector<1x8x4xf32>
    %79 = vector.shape_cast %78 : vector<1x8x4xf32> to vector<8x4xf32>
    %cst_34 = arith.constant dense<0.000000e+00> : vector<8x64xf32>
    %80 = tpu.matmul %79, %77, %cst_34 {dimension_numbers = #tpu.dot_dimension_numbers<[1], [0], [0], [1], [0, 0, 1, 1], [], []>} : vector<8x4xf32>, vector<4x64xf32>, vector<8x64xf32> -> vector<8x64xf32>
    %81 = arith.addf %61, %80 : vector<8x64xf32>
    %c4 = arith.constant 4 : index
    %c0_35 = arith.constant 0 : index
    %c0_36 = arith.constant 0 : index
    %82 = vector.load %arg2[%c4, %c0_35, %c0_36] : memref<9x8x4xf32, #tpu.memory_space<vmem>>, vector<1x8x4xf32>
    %83 = vector.shape_cast %82 : vector<1x8x4xf32> to vector<8x4xf32>
    %cst_37 = arith.constant dense<0.000000e+00> : vector<8x64xf32>
    %84 = tpu.matmul %83, %11, %cst_37 {dimension_numbers = #tpu.dot_dimension_numbers<[1], [0], [0], [1], [0, 0, 1, 1], [], []>} : vector<8x4xf32>, vector<4x64xf32>, vector<8x64xf32> -> vector<8x64xf32>
    %85 = arith.addf %81, %84 : vector<8x64xf32>
    %cst_38 = arith.constant 0.000000e+00 : f32
    %86 = vector.broadcast %cst_38 : f32 to vector<4x1xf32>
    %87 = vector.extract_strided_slice %11 {offsets = [0, 1], sizes = [4, 63], strides = [1, 1]} : vector<4x64xf32> to vector<4x63xf32>
    %88 = tpu.concatenate %87, %86 in 1 : vector<4x63xf32>, vector<4x1xf32> -> vector<4x64xf32>
    %c1_i32_39 = arith.constant 1 : i32
    %89 = vector.broadcast %c1_i32_39 : i32 to vector<1x64xi32>
    %90 = arith.addi %13, %89 : vector<1x64xi32>
    %c0_i32_40 = arith.constant 0 : i32
    %91 = vector.broadcast %c0_i32_40 : i32 to vector<1x64xi32>
    %92 = arith.cmpi sge, %90, %91 : vector<1x64xi32>
    %c1_i32_41 = arith.constant 1 : i32
    %93 = vector.broadcast %c1_i32_41 : i32 to vector<1x64xi32>
    %94 = arith.addi %13, %93 : vector<1x64xi32>
    %c7_i32_42 = arith.constant 7 : i32
    %95 = vector.broadcast %c7_i32_42 : i32 to vector<1x64xi32>
    %96 = arith.cmpi sle, %94, %95 : vector<1x64xi32>
    %97 = arith.andi %92, %96 : vector<1x64xi1>
    %cst_43 = arith.constant 0.000000e+00 : f32
    %98 = vector.shape_cast %97 : vector<1x64xi1> to vector<1x64xi1>
    %99 = vector.broadcast %98 : vector<1x64xi1> to vector<4x64xi1>
    %100 = vector.broadcast %cst_43 : f32 to vector<4x64xf32>
    %101 = arith.select %99, %88, %100 : vector<4x64xi1>, vector<4x64xf32>
    %c5 = arith.constant 5 : index
    %c0_44 = arith.constant 0 : index
    %c0_45 = arith.constant 0 : index
    %102 = vector.load %arg2[%c5, %c0_44, %c0_45] : memref<9x8x4xf32, #tpu.memory_space<vmem>>, vector<1x8x4xf32>
    %103 = vector.shape_cast %102 : vector<1x8x4xf32> to vector<8x4xf32>
    %cst_46 = arith.constant dense<0.000000e+00> : vector<8x64xf32>
    %104 = tpu.matmul %103, %101, %cst_46 {dimension_numbers = #tpu.dot_dimension_numbers<[1], [0], [0], [1], [0, 0, 1, 1], [], []>} : vector<8x4xf32>, vector<4x64xf32>, vector<8x64xf32> -> vector<8x64xf32>
    %105 = arith.addf %85, %104 : vector<8x64xf32>
    %cst_47 = arith.constant 0.000000e+00 : f32
    %106 = vector.broadcast %cst_47 : f32 to vector<4x7xf32>
    %107 = vector.extract_strided_slice %11 {offsets = [0, 7], sizes = [4, 57], strides = [1, 1]} : vector<4x64xf32> to vector<4x57xf32>
    %108 = tpu.concatenate %107, %106 in 1 : vector<4x57xf32>, vector<4x7xf32> -> vector<4x64xf32>
    %c-1_i32_48 = arith.constant -1 : i32
    %109 = vector.broadcast %c-1_i32_48 : i32 to vector<1x64xi32>
    %110 = arith.addi %13, %109 : vector<1x64xi32>
    %c0_i32_49 = arith.constant 0 : i32
    %111 = vector.broadcast %c0_i32_49 : i32 to vector<1x64xi32>
    %112 = arith.cmpi sge, %110, %111 : vector<1x64xi32>
    %c-1_i32_50 = arith.constant -1 : i32
    %113 = vector.broadcast %c-1_i32_50 : i32 to vector<1x64xi32>
    %114 = arith.addi %13, %113 : vector<1x64xi32>
    %c7_i32_51 = arith.constant 7 : i32
    %115 = vector.broadcast %c7_i32_51 : i32 to vector<1x64xi32>
    %116 = arith.cmpi sle, %114, %115 : vector<1x64xi32>
    %117 = arith.andi %112, %116 : vector<1x64xi1>
    %cst_52 = arith.constant 0.000000e+00 : f32
    %118 = vector.shape_cast %117 : vector<1x64xi1> to vector<1x64xi1>
    %119 = vector.broadcast %118 : vector<1x64xi1> to vector<4x64xi1>
    %120 = vector.broadcast %cst_52 : f32 to vector<4x64xf32>
    %121 = arith.select %119, %108, %120 : vector<4x64xi1>, vector<4x64xf32>
    %c6 = arith.constant 6 : index
    %c0_53 = arith.constant 0 : index
    %c0_54 = arith.constant 0 : index
    %122 = vector.load %arg2[%c6, %c0_53, %c0_54] : memref<9x8x4xf32, #tpu.memory_space<vmem>>, vector<1x8x4xf32>
    %123 = vector.shape_cast %122 : vector<1x8x4xf32> to vector<8x4xf32>
    %cst_55 = arith.constant dense<0.000000e+00> : vector<8x64xf32>
    %124 = tpu.matmul %123, %121, %cst_55 {dimension_numbers = #tpu.dot_dimension_numbers<[1], [0], [0], [1], [0, 0, 1, 1], [], []>} : vector<8x4xf32>, vector<4x64xf32>, vector<8x64xf32> -> vector<8x64xf32>
    %125 = arith.addf %105, %124 : vector<8x64xf32>
    %cst_56 = arith.constant 0.000000e+00 : f32
    %126 = vector.broadcast %cst_56 : f32 to vector<4x8xf32>
    %127 = vector.extract_strided_slice %11 {offsets = [0, 8], sizes = [4, 56], strides = [1, 1]} : vector<4x64xf32> to vector<4x56xf32>
    %128 = tpu.concatenate %127, %126 in 1 : vector<4x56xf32>, vector<4x8xf32> -> vector<4x64xf32>
    %c7 = arith.constant 7 : index
    %c0_57 = arith.constant 0 : index
    %c0_58 = arith.constant 0 : index
    %129 = vector.load %arg2[%c7, %c0_57, %c0_58] : memref<9x8x4xf32, #tpu.memory_space<vmem>>, vector<1x8x4xf32>
    %130 = vector.shape_cast %129 : vector<1x8x4xf32> to vector<8x4xf32>
    %cst_59 = arith.constant dense<0.000000e+00> : vector<8x64xf32>
    %131 = tpu.matmul %130, %128, %cst_59 {dimension_numbers = #tpu.dot_dimension_numbers<[1], [0], [0], [1], [0, 0, 1, 1], [], []>} : vector<8x4xf32>, vector<4x64xf32>, vector<8x64xf32> -> vector<8x64xf32>
    %132 = arith.addf %125, %131 : vector<8x64xf32>
    %cst_60 = arith.constant 0.000000e+00 : f32
    %133 = vector.broadcast %cst_60 : f32 to vector<4x9xf32>
    %134 = vector.extract_strided_slice %11 {offsets = [0, 9], sizes = [4, 55], strides = [1, 1]} : vector<4x64xf32> to vector<4x55xf32>
    %135 = tpu.concatenate %134, %133 in 1 : vector<4x55xf32>, vector<4x9xf32> -> vector<4x64xf32>
    %c1_i32_61 = arith.constant 1 : i32
    %136 = vector.broadcast %c1_i32_61 : i32 to vector<1x64xi32>
    %137 = arith.addi %13, %136 : vector<1x64xi32>
    %c0_i32_62 = arith.constant 0 : i32
    %138 = vector.broadcast %c0_i32_62 : i32 to vector<1x64xi32>
    %139 = arith.cmpi sge, %137, %138 : vector<1x64xi32>
    %c1_i32_63 = arith.constant 1 : i32
    %140 = vector.broadcast %c1_i32_63 : i32 to vector<1x64xi32>
    %141 = arith.addi %13, %140 : vector<1x64xi32>
    %c7_i32_64 = arith.constant 7 : i32
    %142 = vector.broadcast %c7_i32_64 : i32 to vector<1x64xi32>
    %143 = arith.cmpi sle, %141, %142 : vector<1x64xi32>
    %144 = arith.andi %139, %143 : vector<1x64xi1>
    %cst_65 = arith.constant 0.000000e+00 : f32
    %145 = vector.shape_cast %144 : vector<1x64xi1> to vector<1x64xi1>
    %146 = vector.broadcast %145 : vector<1x64xi1> to vector<4x64xi1>
    %147 = vector.broadcast %cst_65 : f32 to vector<4x64xf32>
    %148 = arith.select %146, %135, %147 : vector<4x64xi1>, vector<4x64xf32>
    %c8 = arith.constant 8 : index
    %c0_66 = arith.constant 0 : index
    %c0_67 = arith.constant 0 : index
    %149 = vector.load %arg2[%c8, %c0_66, %c0_67] : memref<9x8x4xf32, #tpu.memory_space<vmem>>, vector<1x8x4xf32>
    %150 = vector.shape_cast %149 : vector<1x8x4xf32> to vector<8x4xf32>
    %cst_68 = arith.constant dense<0.000000e+00> : vector<8x64xf32>
    %151 = tpu.matmul %150, %148, %cst_68 {dimension_numbers = #tpu.dot_dimension_numbers<[1], [0], [0], [1], [0, 0, 1, 1], [], []>} : vector<8x4xf32>, vector<4x64xf32>, vector<8x64xf32> -> vector<8x64xf32>
    %152 = arith.addf %132, %151 : vector<8x64xf32>
    %c0_69 = arith.constant 0 : index
    %c0_70 = arith.constant 0 : index
    %153 = vector.load %arg3[%c0_69, %c0_70] : memref<8x1xf32, #tpu.memory_space<vmem>>, vector<8x1xf32>
    %154 = vector.broadcast %153 : vector<8x1xf32> to vector<8x64xf32>
    %155 = arith.addf %152, %154 : vector<8x64xf32>
    %cst_71 = arith.constant 0.000000e+00 : f32
    %156 = vector.broadcast %cst_71 : f32 to vector<8x64xf32>
    %157 = arith.cmpf oge, %155, %156 : vector<8x64xf32>
    %cst_72 = arith.constant 2.000000e-01 : f32
    %158 = vector.broadcast %cst_72 : f32 to vector<8x64xf32>
    %159 = arith.mulf %158, %155 : vector<8x64xf32>
    %160 = arith.select %157, %155, %159 : vector<8x64xi1>, vector<8x64xf32>
    %c0_73 = arith.constant 0 : index
    %c0_74 = arith.constant 0 : index
    %161 = vector.load %arg9[%c0_73, %c0_74] : memref<64x16xf32, #tpu.memory_space<vmem>>, vector<64x16xf32>
    %cst_75 = arith.constant 0.000000e+00 : f32
    %162 = vector.broadcast %cst_75 : f32 to vector<8x1xf32>
    %163 = vector.extract_strided_slice %160 {offsets = [0, 1], sizes = [8, 63], strides = [1, 1]} : vector<8x64xf32> to vector<8x63xf32>
    %164 = tpu.concatenate %163, %162 in 1 : vector<8x63xf32>, vector<8x1xf32> -> vector<8x64xf32>
    %165 = arith.maximumf %160, %164 : vector<8x64xf32>
    %cst_76 = arith.constant 0.000000e+00 : f32
    %166 = vector.broadcast %cst_76 : f32 to vector<8x8xf32>
    %167 = vector.extract_strided_slice %165 {offsets = [0, 8], sizes = [8, 56], strides = [1, 1]} : vector<8x64xf32> to vector<8x56xf32>
    %168 = tpu.concatenate %167, %166 in 1 : vector<8x56xf32>, vector<8x8xf32> -> vector<8x64xf32>
    %169 = arith.maximumf %165, %168 : vector<8x64xf32>
    %cst_77 = arith.constant dense<0.000000e+00> : vector<8x16xf32>
    %170 = tpu.matmul %169, %161, %cst_77 {dimension_numbers = #tpu.dot_dimension_numbers<[1], [0], [0], [1], [0, 0, 1, 1], [], []>} : vector<8x64xf32>, vector<64x16xf32>, vector<8x16xf32> -> vector<8x16xf32>
    %171 = tpu.iota {dimensions = array<i32: 1>} : vector<1x4xi32>
    %172 = tpu.concatenate %171, %171, %171, %171 in 1 : vector<1x4xi32>, vector<1x4xi32>, vector<1x4xi32>, vector<1x4xi32> -> vector<1x16xi32>
    %cst_78 = arith.constant 0.000000e+00 : f32
    %173 = vector.broadcast %cst_78 : f32 to vector<8x16xf32>
    %cst_79 = arith.constant 0.000000e+00 : f32
    %174 = vector.broadcast %cst_79 : f32 to vector<8x5xf32>
    %175 = vector.extract_strided_slice %170 {offsets = [0, 0], sizes = [8, 11], strides = [1, 1]} : vector<8x16xf32> to vector<8x11xf32>
    %176 = tpu.concatenate %174, %175 in 1 : vector<8x5xf32>, vector<8x11xf32> -> vector<8x16xf32>
    %c-1_i32_80 = arith.constant -1 : i32
    %177 = vector.broadcast %c-1_i32_80 : i32 to vector<1x16xi32>
    %178 = arith.addi %172, %177 : vector<1x16xi32>
    %c0_i32_81 = arith.constant 0 : i32
    %179 = vector.broadcast %c0_i32_81 : i32 to vector<1x16xi32>
    %180 = arith.cmpi sge, %178, %179 : vector<1x16xi32>
    %c-1_i32_82 = arith.constant -1 : i32
    %181 = vector.broadcast %c-1_i32_82 : i32 to vector<1x16xi32>
    %182 = arith.addi %172, %181 : vector<1x16xi32>
    %c3_i32 = arith.constant 3 : i32
    %183 = vector.broadcast %c3_i32 : i32 to vector<1x16xi32>
    %184 = arith.cmpi sle, %182, %183 : vector<1x16xi32>
    %185 = arith.andi %180, %184 : vector<1x16xi1>
    %cst_83 = arith.constant 0.000000e+00 : f32
    %186 = vector.shape_cast %185 : vector<1x16xi1> to vector<1x16xi1>
    %187 = vector.broadcast %186 : vector<1x16xi1> to vector<8x16xi1>
    %188 = vector.broadcast %cst_83 : f32 to vector<8x16xf32>
    %189 = arith.select %187, %176, %188 : vector<8x16xi1>, vector<8x16xf32>
    %c0_84 = arith.constant 0 : index
    %c0_85 = arith.constant 0 : index
    %c0_86 = arith.constant 0 : index
    %190 = vector.load %arg4[%c0_84, %c0_85, %c0_86] : memref<9x8x8xf32, #tpu.memory_space<vmem>>, vector<1x8x8xf32>
    %191 = vector.shape_cast %190 : vector<1x8x8xf32> to vector<8x8xf32>
    %cst_87 = arith.constant dense<0.000000e+00> : vector<8x16xf32>
    %192 = tpu.matmul %191, %189, %cst_87 {dimension_numbers = #tpu.dot_dimension_numbers<[1], [0], [0], [1], [0, 0, 1, 1], [], []>} : vector<8x8xf32>, vector<8x16xf32>, vector<8x16xf32> -> vector<8x16xf32>
    %193 = arith.addf %173, %192 : vector<8x16xf32>
    %cst_88 = arith.constant 0.000000e+00 : f32
    %194 = vector.broadcast %cst_88 : f32 to vector<8x4xf32>
    %195 = vector.extract_strided_slice %170 {offsets = [0, 0], sizes = [8, 12], strides = [1, 1]} : vector<8x16xf32> to vector<8x12xf32>
    %196 = tpu.concatenate %194, %195 in 1 : vector<8x4xf32>, vector<8x12xf32> -> vector<8x16xf32>
    %c1_89 = arith.constant 1 : index
    %c0_90 = arith.constant 0 : index
    %c0_91 = arith.constant 0 : index
    %197 = vector.load %arg4[%c1_89, %c0_90, %c0_91] : memref<9x8x8xf32, #tpu.memory_space<vmem>>, vector<1x8x8xf32>
    %198 = vector.shape_cast %197 : vector<1x8x8xf32> to vector<8x8xf32>
    %cst_92 = arith.constant dense<0.000000e+00> : vector<8x16xf32>
    %199 = tpu.matmul %198, %196, %cst_92 {dimension_numbers = #tpu.dot_dimension_numbers<[1], [0], [0], [1], [0, 0, 1, 1], [], []>} : vector<8x8xf32>, vector<8x16xf32>, vector<8x16xf32> -> vector<8x16xf32>
    %200 = arith.addf %193, %199 : vector<8x16xf32>
    %cst_93 = arith.constant 0.000000e+00 : f32
    %201 = vector.broadcast %cst_93 : f32 to vector<8x3xf32>
    %202 = vector.extract_strided_slice %170 {offsets = [0, 0], sizes = [8, 13], strides = [1, 1]} : vector<8x16xf32> to vector<8x13xf32>
    %203 = tpu.concatenate %201, %202 in 1 : vector<8x3xf32>, vector<8x13xf32> -> vector<8x16xf32>
    %c1_i32_94 = arith.constant 1 : i32
    %204 = vector.broadcast %c1_i32_94 : i32 to vector<1x16xi32>
    %205 = arith.addi %172, %204 : vector<1x16xi32>
    %c0_i32_95 = arith.constant 0 : i32
    %206 = vector.broadcast %c0_i32_95 : i32 to vector<1x16xi32>
    %207 = arith.cmpi sge, %205, %206 : vector<1x16xi32>
    %c1_i32_96 = arith.constant 1 : i32
    %208 = vector.broadcast %c1_i32_96 : i32 to vector<1x16xi32>
    %209 = arith.addi %172, %208 : vector<1x16xi32>
    %c3_i32_97 = arith.constant 3 : i32
    %210 = vector.broadcast %c3_i32_97 : i32 to vector<1x16xi32>
    %211 = arith.cmpi sle, %209, %210 : vector<1x16xi32>
    %212 = arith.andi %207, %211 : vector<1x16xi1>
    %cst_98 = arith.constant 0.000000e+00 : f32
    %213 = vector.shape_cast %212 : vector<1x16xi1> to vector<1x16xi1>
    %214 = vector.broadcast %213 : vector<1x16xi1> to vector<8x16xi1>
    %215 = vector.broadcast %cst_98 : f32 to vector<8x16xf32>
    %216 = arith.select %214, %203, %215 : vector<8x16xi1>, vector<8x16xf32>
    %c2_99 = arith.constant 2 : index
    %c0_100 = arith.constant 0 : index
    %c0_101 = arith.constant 0 : index
    %217 = vector.load %arg4[%c2_99, %c0_100, %c0_101] : memref<9x8x8xf32, #tpu.memory_space<vmem>>, vector<1x8x8xf32>
    %218 = vector.shape_cast %217 : vector<1x8x8xf32> to vector<8x8xf32>
    %cst_102 = arith.constant dense<0.000000e+00> : vector<8x16xf32>
    %219 = tpu.matmul %218, %216, %cst_102 {dimension_numbers = #tpu.dot_dimension_numbers<[1], [0], [0], [1], [0, 0, 1, 1], [], []>} : vector<8x8xf32>, vector<8x16xf32>, vector<8x16xf32> -> vector<8x16xf32>
    %220 = arith.addf %200, %219 : vector<8x16xf32>
    %cst_103 = arith.constant 0.000000e+00 : f32
    %221 = vector.broadcast %cst_103 : f32 to vector<8x1xf32>
    %222 = vector.extract_strided_slice %170 {offsets = [0, 0], sizes = [8, 15], strides = [1, 1]} : vector<8x16xf32> to vector<8x15xf32>
    %223 = tpu.concatenate %221, %222 in 1 : vector<8x1xf32>, vector<8x15xf32> -> vector<8x16xf32>
    %c-1_i32_104 = arith.constant -1 : i32
    %224 = vector.broadcast %c-1_i32_104 : i32 to vector<1x16xi32>
    %225 = arith.addi %172, %224 : vector<1x16xi32>
    %c0_i32_105 = arith.constant 0 : i32
    %226 = vector.broadcast %c0_i32_105 : i32 to vector<1x16xi32>
    %227 = arith.cmpi sge, %225, %226 : vector<1x16xi32>
    %c-1_i32_106 = arith.constant -1 : i32
    %228 = vector.broadcast %c-1_i32_106 : i32 to vector<1x16xi32>
    %229 = arith.addi %172, %228 : vector<1x16xi32>
    %c3_i32_107 = arith.constant 3 : i32
    %230 = vector.broadcast %c3_i32_107 : i32 to vector<1x16xi32>
    %231 = arith.cmpi sle, %229, %230 : vector<1x16xi32>
    %232 = arith.andi %227, %231 : vector<1x16xi1>
    %cst_108 = arith.constant 0.000000e+00 : f32
    %233 = vector.shape_cast %232 : vector<1x16xi1> to vector<1x16xi1>
    %234 = vector.broadcast %233 : vector<1x16xi1> to vector<8x16xi1>
    %235 = vector.broadcast %cst_108 : f32 to vector<8x16xf32>
    %236 = arith.select %234, %223, %235 : vector<8x16xi1>, vector<8x16xf32>
    %c3_109 = arith.constant 3 : index
    %c0_110 = arith.constant 0 : index
    %c0_111 = arith.constant 0 : index
    %237 = vector.load %arg4[%c3_109, %c0_110, %c0_111] : memref<9x8x8xf32, #tpu.memory_space<vmem>>, vector<1x8x8xf32>
    %238 = vector.shape_cast %237 : vector<1x8x8xf32> to vector<8x8xf32>
    %cst_112 = arith.constant dense<0.000000e+00> : vector<8x16xf32>
    %239 = tpu.matmul %238, %236, %cst_112 {dimension_numbers = #tpu.dot_dimension_numbers<[1], [0], [0], [1], [0, 0, 1, 1], [], []>} : vector<8x8xf32>, vector<8x16xf32>, vector<8x16xf32> -> vector<8x16xf32>
    %240 = arith.addf %220, %239 : vector<8x16xf32>
    %c4_113 = arith.constant 4 : index
    %c0_114 = arith.constant 0 : index
    %c0_115 = arith.constant 0 : index
    %241 = vector.load %arg4[%c4_113, %c0_114, %c0_115] : memref<9x8x8xf32, #tpu.memory_space<vmem>>, vector<1x8x8xf32>
    %242 = vector.shape_cast %241 : vector<1x8x8xf32> to vector<8x8xf32>
    %cst_116 = arith.constant dense<0.000000e+00> : vector<8x16xf32>
    %243 = tpu.matmul %242, %170, %cst_116 {dimension_numbers = #tpu.dot_dimension_numbers<[1], [0], [0], [1], [0, 0, 1, 1], [], []>} : vector<8x8xf32>, vector<8x16xf32>, vector<8x16xf32> -> vector<8x16xf32>
    %244 = arith.addf %240, %243 : vector<8x16xf32>
    %cst_117 = arith.constant 0.000000e+00 : f32
    %245 = vector.broadcast %cst_117 : f32 to vector<8x1xf32>
    %246 = vector.extract_strided_slice %170 {offsets = [0, 1], sizes = [8, 15], strides = [1, 1]} : vector<8x16xf32> to vector<8x15xf32>
    %247 = tpu.concatenate %246, %245 in 1 : vector<8x15xf32>, vector<8x1xf32> -> vector<8x16xf32>
    %c1_i32_118 = arith.constant 1 : i32
    %248 = vector.broadcast %c1_i32_118 : i32 to vector<1x16xi32>
    %249 = arith.addi %172, %248 : vector<1x16xi32>
    %c0_i32_119 = arith.constant 0 : i32
    %250 = vector.broadcast %c0_i32_119 : i32 to vector<1x16xi32>
    %251 = arith.cmpi sge, %249, %250 : vector<1x16xi32>
    %c1_i32_120 = arith.constant 1 : i32
    %252 = vector.broadcast %c1_i32_120 : i32 to vector<1x16xi32>
    %253 = arith.addi %172, %252 : vector<1x16xi32>
    %c3_i32_121 = arith.constant 3 : i32
    %254 = vector.broadcast %c3_i32_121 : i32 to vector<1x16xi32>
    %255 = arith.cmpi sle, %253, %254 : vector<1x16xi32>
    %256 = arith.andi %251, %255 : vector<1x16xi1>
    %cst_122 = arith.constant 0.000000e+00 : f32
    %257 = vector.shape_cast %256 : vector<1x16xi1> to vector<1x16xi1>
    %258 = vector.broadcast %257 : vector<1x16xi1> to vector<8x16xi1>
    %259 = vector.broadcast %cst_122 : f32 to vector<8x16xf32>
    %260 = arith.select %258, %247, %259 : vector<8x16xi1>, vector<8x16xf32>
    %c5_123 = arith.constant 5 : index
    %c0_124 = arith.constant 0 : index
    %c0_125 = arith.constant 0 : index
    %261 = vector.load %arg4[%c5_123, %c0_124, %c0_125] : memref<9x8x8xf32, #tpu.memory_space<vmem>>, vector<1x8x8xf32>
    %262 = vector.shape_cast %261 : vector<1x8x8xf32> to vector<8x8xf32>
    %cst_126 = arith.constant dense<0.000000e+00> : vector<8x16xf32>
    %263 = tpu.matmul %262, %260, %cst_126 {dimension_numbers = #tpu.dot_dimension_numbers<[1], [0], [0], [1], [0, 0, 1, 1], [], []>} : vector<8x8xf32>, vector<8x16xf32>, vector<8x16xf32> -> vector<8x16xf32>
    %264 = arith.addf %244, %263 : vector<8x16xf32>
    %cst_127 = arith.constant 0.000000e+00 : f32
    %265 = vector.broadcast %cst_127 : f32 to vector<8x3xf32>
    %266 = vector.extract_strided_slice %170 {offsets = [0, 3], sizes = [8, 13], strides = [1, 1]} : vector<8x16xf32> to vector<8x13xf32>
    %267 = tpu.concatenate %266, %265 in 1 : vector<8x13xf32>, vector<8x3xf32> -> vector<8x16xf32>
    %c-1_i32_128 = arith.constant -1 : i32
    %268 = vector.broadcast %c-1_i32_128 : i32 to vector<1x16xi32>
    %269 = arith.addi %172, %268 : vector<1x16xi32>
    %c0_i32_129 = arith.constant 0 : i32
    %270 = vector.broadcast %c0_i32_129 : i32 to vector<1x16xi32>
    %271 = arith.cmpi sge, %269, %270 : vector<1x16xi32>
    %c-1_i32_130 = arith.constant -1 : i32
    %272 = vector.broadcast %c-1_i32_130 : i32 to vector<1x16xi32>
    %273 = arith.addi %172, %272 : vector<1x16xi32>
    %c3_i32_131 = arith.constant 3 : i32
    %274 = vector.broadcast %c3_i32_131 : i32 to vector<1x16xi32>
    %275 = arith.cmpi sle, %273, %274 : vector<1x16xi32>
    %276 = arith.andi %271, %275 : vector<1x16xi1>
    %cst_132 = arith.constant 0.000000e+00 : f32
    %277 = vector.shape_cast %276 : vector<1x16xi1> to vector<1x16xi1>
    %278 = vector.broadcast %277 : vector<1x16xi1> to vector<8x16xi1>
    %279 = vector.broadcast %cst_132 : f32 to vector<8x16xf32>
    %280 = arith.select %278, %267, %279 : vector<8x16xi1>, vector<8x16xf32>
    %c6_133 = arith.constant 6 : index
    %c0_134 = arith.constant 0 : index
    %c0_135 = arith.constant 0 : index
    %281 = vector.load %arg4[%c6_133, %c0_134, %c0_135] : memref<9x8x8xf32, #tpu.memory_space<vmem>>, vector<1x8x8xf32>
    %282 = vector.shape_cast %281 : vector<1x8x8xf32> to vector<8x8xf32>
    %cst_136 = arith.constant dense<0.000000e+00> : vector<8x16xf32>
    %283 = tpu.matmul %282, %280, %cst_136 {dimension_numbers = #tpu.dot_dimension_numbers<[1], [0], [0], [1], [0, 0, 1, 1], [], []>} : vector<8x8xf32>, vector<8x16xf32>, vector<8x16xf32> -> vector<8x16xf32>
    %284 = arith.addf %264, %283 : vector<8x16xf32>
    %cst_137 = arith.constant 0.000000e+00 : f32
    %285 = vector.broadcast %cst_137 : f32 to vector<8x4xf32>
    %286 = vector.extract_strided_slice %170 {offsets = [0, 4], sizes = [8, 12], strides = [1, 1]} : vector<8x16xf32> to vector<8x12xf32>
    %287 = tpu.concatenate %286, %285 in 1 : vector<8x12xf32>, vector<8x4xf32> -> vector<8x16xf32>
    %c7_138 = arith.constant 7 : index
    %c0_139 = arith.constant 0 : index
    %c0_140 = arith.constant 0 : index
    %288 = vector.load %arg4[%c7_138, %c0_139, %c0_140] : memref<9x8x8xf32, #tpu.memory_space<vmem>>, vector<1x8x8xf32>
    %289 = vector.shape_cast %288 : vector<1x8x8xf32> to vector<8x8xf32>
    %cst_141 = arith.constant dense<0.000000e+00> : vector<8x16xf32>
    %290 = tpu.matmul %289, %287, %cst_141 {dimension_numbers = #tpu.dot_dimension_numbers<[1], [0], [0], [1], [0, 0, 1, 1], [], []>} : vector<8x8xf32>, vector<8x16xf32>, vector<8x16xf32> -> vector<8x16xf32>
    %291 = arith.addf %284, %290 : vector<8x16xf32>
    %cst_142 = arith.constant 0.000000e+00 : f32
    %292 = vector.broadcast %cst_142 : f32 to vector<8x5xf32>
    %293 = vector.extract_strided_slice %170 {offsets = [0, 5], sizes = [8, 11], strides = [1, 1]} : vector<8x16xf32> to vector<8x11xf32>
    %294 = tpu.concatenate %293, %292 in 1 : vector<8x11xf32>, vector<8x5xf32> -> vector<8x16xf32>
    %c1_i32_143 = arith.constant 1 : i32
    %295 = vector.broadcast %c1_i32_143 : i32 to vector<1x16xi32>
    %296 = arith.addi %172, %295 : vector<1x16xi32>
    %c0_i32_144 = arith.constant 0 : i32
    %297 = vector.broadcast %c0_i32_144 : i32 to vector<1x16xi32>
    %298 = arith.cmpi sge, %296, %297 : vector<1x16xi32>
    %c1_i32_145 = arith.constant 1 : i32
    %299 = vector.broadcast %c1_i32_145 : i32 to vector<1x16xi32>
    %300 = arith.addi %172, %299 : vector<1x16xi32>
    %c3_i32_146 = arith.constant 3 : i32
    %301 = vector.broadcast %c3_i32_146 : i32 to vector<1x16xi32>
    %302 = arith.cmpi sle, %300, %301 : vector<1x16xi32>
    %303 = arith.andi %298, %302 : vector<1x16xi1>
    %cst_147 = arith.constant 0.000000e+00 : f32
    %304 = vector.shape_cast %303 : vector<1x16xi1> to vector<1x16xi1>
    %305 = vector.broadcast %304 : vector<1x16xi1> to vector<8x16xi1>
    %306 = vector.broadcast %cst_147 : f32 to vector<8x16xf32>
    %307 = arith.select %305, %294, %306 : vector<8x16xi1>, vector<8x16xf32>
    %c8_148 = arith.constant 8 : index
    %c0_149 = arith.constant 0 : index
    %c0_150 = arith.constant 0 : index
    %308 = vector.load %arg4[%c8_148, %c0_149, %c0_150] : memref<9x8x8xf32, #tpu.memory_space<vmem>>, vector<1x8x8xf32>
    %309 = vector.shape_cast %308 : vector<1x8x8xf32> to vector<8x8xf32>
    %cst_151 = arith.constant dense<0.000000e+00> : vector<8x16xf32>
    %310 = tpu.matmul %309, %307, %cst_151 {dimension_numbers = #tpu.dot_dimension_numbers<[1], [0], [0], [1], [0, 0, 1, 1], [], []>} : vector<8x8xf32>, vector<8x16xf32>, vector<8x16xf32> -> vector<8x16xf32>
    %311 = arith.addf %291, %310 : vector<8x16xf32>
    %c0_152 = arith.constant 0 : index
    %c0_153 = arith.constant 0 : index
    %312 = vector.load %arg5[%c0_152, %c0_153] : memref<8x1xf32, #tpu.memory_space<vmem>>, vector<8x1xf32>
    %313 = vector.broadcast %312 : vector<8x1xf32> to vector<8x16xf32>
    %314 = arith.addf %311, %313 : vector<8x16xf32>
    %cst_154 = arith.constant 0.000000e+00 : f32
    %315 = vector.broadcast %cst_154 : f32 to vector<8x16xf32>
    %316 = arith.cmpf oge, %314, %315 : vector<8x16xf32>
    %cst_155 = arith.constant 2.000000e-01 : f32
    %317 = vector.broadcast %cst_155 : f32 to vector<8x16xf32>
    %318 = arith.mulf %317, %314 : vector<8x16xf32>
    %319 = arith.select %316, %314, %318 : vector<8x16xi1>, vector<8x16xf32>
    %c0_156 = arith.constant 0 : index
    %c0_157 = arith.constant 0 : index
    %320 = vector.load %arg10[%c0_156, %c0_157] : memref<16x64xf32, #tpu.memory_space<vmem>>, vector<16x64xf32>
    %cst_158 = arith.constant dense<0.000000e+00> : vector<8x64xf32>
    %321 = tpu.matmul %319, %320, %cst_158 {dimension_numbers = #tpu.dot_dimension_numbers<[1], [0], [0], [1], [0, 0, 1, 1], [], []>} : vector<8x16xf32>, vector<16x64xf32>, vector<8x64xf32> -> vector<8x64xf32>
    %322 = tpu.iota {dimensions = array<i32: 1>} : vector<1x8xi32>
    %323 = tpu.concatenate %322, %322, %322, %322, %322, %322, %322, %322 in 1 : vector<1x8xi32>, vector<1x8xi32>, vector<1x8xi32>, vector<1x8xi32>, vector<1x8xi32>, vector<1x8xi32>, vector<1x8xi32>, vector<1x8xi32> -> vector<1x64xi32>
    %cst_159 = arith.constant 0.000000e+00 : f32
    %324 = vector.broadcast %cst_159 : f32 to vector<8x64xf32>
    %cst_160 = arith.constant 0.000000e+00 : f32
    %325 = vector.broadcast %cst_160 : f32 to vector<8x9xf32>
    %326 = vector.extract_strided_slice %321 {offsets = [0, 0], sizes = [8, 55], strides = [1, 1]} : vector<8x64xf32> to vector<8x55xf32>
    %327 = tpu.concatenate %325, %326 in 1 : vector<8x9xf32>, vector<8x55xf32> -> vector<8x64xf32>
    %c-1_i32_161 = arith.constant -1 : i32
    %328 = vector.broadcast %c-1_i32_161 : i32 to vector<1x64xi32>
    %329 = arith.addi %323, %328 : vector<1x64xi32>
    %c0_i32_162 = arith.constant 0 : i32
    %330 = vector.broadcast %c0_i32_162 : i32 to vector<1x64xi32>
    %331 = arith.cmpi sge, %329, %330 : vector<1x64xi32>
    %c-1_i32_163 = arith.constant -1 : i32
    %332 = vector.broadcast %c-1_i32_163 : i32 to vector<1x64xi32>
    %333 = arith.addi %323, %332 : vector<1x64xi32>
    %c7_i32_164 = arith.constant 7 : i32
    %334 = vector.broadcast %c7_i32_164 : i32 to vector<1x64xi32>
    %335 = arith.cmpi sle, %333, %334 : vector<1x64xi32>
    %336 = arith.andi %331, %335 : vector<1x64xi1>
    %cst_165 = arith.constant 0.000000e+00 : f32
    %337 = vector.shape_cast %336 : vector<1x64xi1> to vector<1x64xi1>
    %338 = vector.broadcast %337 : vector<1x64xi1> to vector<8x64xi1>
    %339 = vector.broadcast %cst_165 : f32 to vector<8x64xf32>
    %340 = arith.select %338, %327, %339 : vector<8x64xi1>, vector<8x64xf32>
    %c0_166 = arith.constant 0 : index
    %c0_167 = arith.constant 0 : index
    %c0_168 = arith.constant 0 : index
    %341 = vector.load %arg4[%c0_166, %c0_167, %c0_168] : memref<9x8x8xf32, #tpu.memory_space<vmem>>, vector<1x8x8xf32>
    %342 = vector.shape_cast %341 : vector<1x8x8xf32> to vector<8x8xf32>
    %cst_169 = arith.constant dense<0.000000e+00> : vector<8x64xf32>
    %343 = tpu.matmul %342, %340, %cst_169 {dimension_numbers = #tpu.dot_dimension_numbers<[1], [0], [0], [1], [0, 0, 1, 1], [], []>} : vector<8x8xf32>, vector<8x64xf32>, vector<8x64xf32> -> vector<8x64xf32>
    %344 = arith.addf %324, %343 : vector<8x64xf32>
    %cst_170 = arith.constant 0.000000e+00 : f32
    %345 = vector.broadcast %cst_170 : f32 to vector<8x8xf32>
    %346 = vector.extract_strided_slice %321 {offsets = [0, 0], sizes = [8, 56], strides = [1, 1]} : vector<8x64xf32> to vector<8x56xf32>
    %347 = tpu.concatenate %345, %346 in 1 : vector<8x8xf32>, vector<8x56xf32> -> vector<8x64xf32>
    %c1_171 = arith.constant 1 : index
    %c0_172 = arith.constant 0 : index
    %c0_173 = arith.constant 0 : index
    %348 = vector.load %arg4[%c1_171, %c0_172, %c0_173] : memref<9x8x8xf32, #tpu.memory_space<vmem>>, vector<1x8x8xf32>
    %349 = vector.shape_cast %348 : vector<1x8x8xf32> to vector<8x8xf32>
    %cst_174 = arith.constant dense<0.000000e+00> : vector<8x64xf32>
    %350 = tpu.matmul %349, %347, %cst_174 {dimension_numbers = #tpu.dot_dimension_numbers<[1], [0], [0], [1], [0, 0, 1, 1], [], []>} : vector<8x8xf32>, vector<8x64xf32>, vector<8x64xf32> -> vector<8x64xf32>
    %351 = arith.addf %344, %350 : vector<8x64xf32>
    %cst_175 = arith.constant 0.000000e+00 : f32
    %352 = vector.broadcast %cst_175 : f32 to vector<8x7xf32>
    %353 = vector.extract_strided_slice %321 {offsets = [0, 0], sizes = [8, 57], strides = [1, 1]} : vector<8x64xf32> to vector<8x57xf32>
    %354 = tpu.concatenate %352, %353 in 1 : vector<8x7xf32>, vector<8x57xf32> -> vector<8x64xf32>
    %c1_i32_176 = arith.constant 1 : i32
    %355 = vector.broadcast %c1_i32_176 : i32 to vector<1x64xi32>
    %356 = arith.addi %323, %355 : vector<1x64xi32>
    %c0_i32_177 = arith.constant 0 : i32
    %357 = vector.broadcast %c0_i32_177 : i32 to vector<1x64xi32>
    %358 = arith.cmpi sge, %356, %357 : vector<1x64xi32>
    %c1_i32_178 = arith.constant 1 : i32
    %359 = vector.broadcast %c1_i32_178 : i32 to vector<1x64xi32>
    %360 = arith.addi %323, %359 : vector<1x64xi32>
    %c7_i32_179 = arith.constant 7 : i32
    %361 = vector.broadcast %c7_i32_179 : i32 to vector<1x64xi32>
    %362 = arith.cmpi sle, %360, %361 : vector<1x64xi32>
    %363 = arith.andi %358, %362 : vector<1x64xi1>
    %cst_180 = arith.constant 0.000000e+00 : f32
    %364 = vector.shape_cast %363 : vector<1x64xi1> to vector<1x64xi1>
    %365 = vector.broadcast %364 : vector<1x64xi1> to vector<8x64xi1>
    %366 = vector.broadcast %cst_180 : f32 to vector<8x64xf32>
    %367 = arith.select %365, %354, %366 : vector<8x64xi1>, vector<8x64xf32>
    %c2_181 = arith.constant 2 : index
    %c0_182 = arith.constant 0 : index
    %c0_183 = arith.constant 0 : index
    %368 = vector.load %arg4[%c2_181, %c0_182, %c0_183] : memref<9x8x8xf32, #tpu.memory_space<vmem>>, vector<1x8x8xf32>
    %369 = vector.shape_cast %368 : vector<1x8x8xf32> to vector<8x8xf32>
    %cst_184 = arith.constant dense<0.000000e+00> : vector<8x64xf32>
    %370 = tpu.matmul %369, %367, %cst_184 {dimension_numbers = #tpu.dot_dimension_numbers<[1], [0], [0], [1], [0, 0, 1, 1], [], []>} : vector<8x8xf32>, vector<8x64xf32>, vector<8x64xf32> -> vector<8x64xf32>
    %371 = arith.addf %351, %370 : vector<8x64xf32>
    %cst_185 = arith.constant 0.000000e+00 : f32
    %372 = vector.broadcast %cst_185 : f32 to vector<8x1xf32>
    %373 = vector.extract_strided_slice %321 {offsets = [0, 0], sizes = [8, 63], strides = [1, 1]} : vector<8x64xf32> to vector<8x63xf32>
    %374 = tpu.concatenate %372, %373 in 1 : vector<8x1xf32>, vector<8x63xf32> -> vector<8x64xf32>
    %c-1_i32_186 = arith.constant -1 : i32
    %375 = vector.broadcast %c-1_i32_186 : i32 to vector<1x64xi32>
    %376 = arith.addi %323, %375 : vector<1x64xi32>
    %c0_i32_187 = arith.constant 0 : i32
    %377 = vector.broadcast %c0_i32_187 : i32 to vector<1x64xi32>
    %378 = arith.cmpi sge, %376, %377 : vector<1x64xi32>
    %c-1_i32_188 = arith.constant -1 : i32
    %379 = vector.broadcast %c-1_i32_188 : i32 to vector<1x64xi32>
    %380 = arith.addi %323, %379 : vector<1x64xi32>
    %c7_i32_189 = arith.constant 7 : i32
    %381 = vector.broadcast %c7_i32_189 : i32 to vector<1x64xi32>
    %382 = arith.cmpi sle, %380, %381 : vector<1x64xi32>
    %383 = arith.andi %378, %382 : vector<1x64xi1>
    %cst_190 = arith.constant 0.000000e+00 : f32
    %384 = vector.shape_cast %383 : vector<1x64xi1> to vector<1x64xi1>
    %385 = vector.broadcast %384 : vector<1x64xi1> to vector<8x64xi1>
    %386 = vector.broadcast %cst_190 : f32 to vector<8x64xf32>
    %387 = arith.select %385, %374, %386 : vector<8x64xi1>, vector<8x64xf32>
    %c3_191 = arith.constant 3 : index
    %c0_192 = arith.constant 0 : index
    %c0_193 = arith.constant 0 : index
    %388 = vector.load %arg4[%c3_191, %c0_192, %c0_193] : memref<9x8x8xf32, #tpu.memory_space<vmem>>, vector<1x8x8xf32>
    %389 = vector.shape_cast %388 : vector<1x8x8xf32> to vector<8x8xf32>
    %cst_194 = arith.constant dense<0.000000e+00> : vector<8x64xf32>
    %390 = tpu.matmul %389, %387, %cst_194 {dimension_numbers = #tpu.dot_dimension_numbers<[1], [0], [0], [1], [0, 0, 1, 1], [], []>} : vector<8x8xf32>, vector<8x64xf32>, vector<8x64xf32> -> vector<8x64xf32>
    %391 = arith.addf %371, %390 : vector<8x64xf32>
    %c4_195 = arith.constant 4 : index
    %c0_196 = arith.constant 0 : index
    %c0_197 = arith.constant 0 : index
    %392 = vector.load %arg4[%c4_195, %c0_196, %c0_197] : memref<9x8x8xf32, #tpu.memory_space<vmem>>, vector<1x8x8xf32>
    %393 = vector.shape_cast %392 : vector<1x8x8xf32> to vector<8x8xf32>
    %cst_198 = arith.constant dense<0.000000e+00> : vector<8x64xf32>
    %394 = tpu.matmul %393, %321, %cst_198 {dimension_numbers = #tpu.dot_dimension_numbers<[1], [0], [0], [1], [0, 0, 1, 1], [], []>} : vector<8x8xf32>, vector<8x64xf32>, vector<8x64xf32> -> vector<8x64xf32>
    %395 = arith.addf %391, %394 : vector<8x64xf32>
    %cst_199 = arith.constant 0.000000e+00 : f32
    %396 = vector.broadcast %cst_199 : f32 to vector<8x1xf32>
    %397 = vector.extract_strided_slice %321 {offsets = [0, 1], sizes = [8, 63], strides = [1, 1]} : vector<8x64xf32> to vector<8x63xf32>
    %398 = tpu.concatenate %397, %396 in 1 : vector<8x63xf32>, vector<8x1xf32> -> vector<8x64xf32>
    %c1_i32_200 = arith.constant 1 : i32
    %399 = vector.broadcast %c1_i32_200 : i32 to vector<1x64xi32>
    %400 = arith.addi %323, %399 : vector<1x64xi32>
    %c0_i32_201 = arith.constant 0 : i32
    %401 = vector.broadcast %c0_i32_201 : i32 to vector<1x64xi32>
    %402 = arith.cmpi sge, %400, %401 : vector<1x64xi32>
    %c1_i32_202 = arith.constant 1 : i32
    %403 = vector.broadcast %c1_i32_202 : i32 to vector<1x64xi32>
    %404 = arith.addi %323, %403 : vector<1x64xi32>
    %c7_i32_203 = arith.constant 7 : i32
    %405 = vector.broadcast %c7_i32_203 : i32 to vector<1x64xi32>
    %406 = arith.cmpi sle, %404, %405 : vector<1x64xi32>
    %407 = arith.andi %402, %406 : vector<1x64xi1>
    %cst_204 = arith.constant 0.000000e+00 : f32
    %408 = vector.shape_cast %407 : vector<1x64xi1> to vector<1x64xi1>
    %409 = vector.broadcast %408 : vector<1x64xi1> to vector<8x64xi1>
    %410 = vector.broadcast %cst_204 : f32 to vector<8x64xf32>
    %411 = arith.select %409, %398, %410 : vector<8x64xi1>, vector<8x64xf32>
    %c5_205 = arith.constant 5 : index
    %c0_206 = arith.constant 0 : index
    %c0_207 = arith.constant 0 : index
    %412 = vector.load %arg4[%c5_205, %c0_206, %c0_207] : memref<9x8x8xf32, #tpu.memory_space<vmem>>, vector<1x8x8xf32>
    %413 = vector.shape_cast %412 : vector<1x8x8xf32> to vector<8x8xf32>
    %cst_208 = arith.constant dense<0.000000e+00> : vector<8x64xf32>
    %414 = tpu.matmul %413, %411, %cst_208 {dimension_numbers = #tpu.dot_dimension_numbers<[1], [0], [0], [1], [0, 0, 1, 1], [], []>} : vector<8x8xf32>, vector<8x64xf32>, vector<8x64xf32> -> vector<8x64xf32>
    %415 = arith.addf %395, %414 : vector<8x64xf32>
    %cst_209 = arith.constant 0.000000e+00 : f32
    %416 = vector.broadcast %cst_209 : f32 to vector<8x7xf32>
    %417 = vector.extract_strided_slice %321 {offsets = [0, 7], sizes = [8, 57], strides = [1, 1]} : vector<8x64xf32> to vector<8x57xf32>
    %418 = tpu.concatenate %417, %416 in 1 : vector<8x57xf32>, vector<8x7xf32> -> vector<8x64xf32>
    %c-1_i32_210 = arith.constant -1 : i32
    %419 = vector.broadcast %c-1_i32_210 : i32 to vector<1x64xi32>
    %420 = arith.addi %323, %419 : vector<1x64xi32>
    %c0_i32_211 = arith.constant 0 : i32
    %421 = vector.broadcast %c0_i32_211 : i32 to vector<1x64xi32>
    %422 = arith.cmpi sge, %420, %421 : vector<1x64xi32>
    %c-1_i32_212 = arith.constant -1 : i32
    %423 = vector.broadcast %c-1_i32_212 : i32 to vector<1x64xi32>
    %424 = arith.addi %323, %423 : vector<1x64xi32>
    %c7_i32_213 = arith.constant 7 : i32
    %425 = vector.broadcast %c7_i32_213 : i32 to vector<1x64xi32>
    %426 = arith.cmpi sle, %424, %425 : vector<1x64xi32>
    %427 = arith.andi %422, %426 : vector<1x64xi1>
    %cst_214 = arith.constant 0.000000e+00 : f32
    %428 = vector.shape_cast %427 : vector<1x64xi1> to vector<1x64xi1>
    %429 = vector.broadcast %428 : vector<1x64xi1> to vector<8x64xi1>
    %430 = vector.broadcast %cst_214 : f32 to vector<8x64xf32>
    %431 = arith.select %429, %418, %430 : vector<8x64xi1>, vector<8x64xf32>
    %c6_215 = arith.constant 6 : index
    %c0_216 = arith.constant 0 : index
    %c0_217 = arith.constant 0 : index
    %432 = vector.load %arg4[%c6_215, %c0_216, %c0_217] : memref<9x8x8xf32, #tpu.memory_space<vmem>>, vector<1x8x8xf32>
    %433 = vector.shape_cast %432 : vector<1x8x8xf32> to vector<8x8xf32>
    %cst_218 = arith.constant dense<0.000000e+00> : vector<8x64xf32>
    %434 = tpu.matmul %433, %431, %cst_218 {dimension_numbers = #tpu.dot_dimension_numbers<[1], [0], [0], [1], [0, 0, 1, 1], [], []>} : vector<8x8xf32>, vector<8x64xf32>, vector<8x64xf32> -> vector<8x64xf32>
    %435 = arith.addf %415, %434 : vector<8x64xf32>
    %cst_219 = arith.constant 0.000000e+00 : f32
    %436 = vector.broadcast %cst_219 : f32 to vector<8x8xf32>
    %437 = vector.extract_strided_slice %321 {offsets = [0, 8], sizes = [8, 56], strides = [1, 1]} : vector<8x64xf32> to vector<8x56xf32>
    %438 = tpu.concatenate %437, %436 in 1 : vector<8x56xf32>, vector<8x8xf32> -> vector<8x64xf32>
    %c7_220 = arith.constant 7 : index
    %c0_221 = arith.constant 0 : index
    %c0_222 = arith.constant 0 : index
    %439 = vector.load %arg4[%c7_220, %c0_221, %c0_222] : memref<9x8x8xf32, #tpu.memory_space<vmem>>, vector<1x8x8xf32>
    %440 = vector.shape_cast %439 : vector<1x8x8xf32> to vector<8x8xf32>
    %cst_223 = arith.constant dense<0.000000e+00> : vector<8x64xf32>
    %441 = tpu.matmul %440, %438, %cst_223 {dimension_numbers = #tpu.dot_dimension_numbers<[1], [0], [0], [1], [0, 0, 1, 1], [], []>} : vector<8x8xf32>, vector<8x64xf32>, vector<8x64xf32> -> vector<8x64xf32>
    %442 = arith.addf %435, %441 : vector<8x64xf32>
    %cst_224 = arith.constant 0.000000e+00 : f32
    %443 = vector.broadcast %cst_224 : f32 to vector<8x9xf32>
    %444 = vector.extract_strided_slice %321 {offsets = [0, 9], sizes = [8, 55], strides = [1, 1]} : vector<8x64xf32> to vector<8x55xf32>
    %445 = tpu.concatenate %444, %443 in 1 : vector<8x55xf32>, vector<8x9xf32> -> vector<8x64xf32>
    %c1_i32_225 = arith.constant 1 : i32
    %446 = vector.broadcast %c1_i32_225 : i32 to vector<1x64xi32>
    %447 = arith.addi %323, %446 : vector<1x64xi32>
    %c0_i32_226 = arith.constant 0 : i32
    %448 = vector.broadcast %c0_i32_226 : i32 to vector<1x64xi32>
    %449 = arith.cmpi sge, %447, %448 : vector<1x64xi32>
    %c1_i32_227 = arith.constant 1 : i32
    %450 = vector.broadcast %c1_i32_227 : i32 to vector<1x64xi32>
    %451 = arith.addi %323, %450 : vector<1x64xi32>
    %c7_i32_228 = arith.constant 7 : i32
    %452 = vector.broadcast %c7_i32_228 : i32 to vector<1x64xi32>
    %453 = arith.cmpi sle, %451, %452 : vector<1x64xi32>
    %454 = arith.andi %449, %453 : vector<1x64xi1>
    %cst_229 = arith.constant 0.000000e+00 : f32
    %455 = vector.shape_cast %454 : vector<1x64xi1> to vector<1x64xi1>
    %456 = vector.broadcast %455 : vector<1x64xi1> to vector<8x64xi1>
    %457 = vector.broadcast %cst_229 : f32 to vector<8x64xf32>
    %458 = arith.select %456, %445, %457 : vector<8x64xi1>, vector<8x64xf32>
    %c8_230 = arith.constant 8 : index
    %c0_231 = arith.constant 0 : index
    %c0_232 = arith.constant 0 : index
    %459 = vector.load %arg4[%c8_230, %c0_231, %c0_232] : memref<9x8x8xf32, #tpu.memory_space<vmem>>, vector<1x8x8xf32>
    %460 = vector.shape_cast %459 : vector<1x8x8xf32> to vector<8x8xf32>
    %cst_233 = arith.constant dense<0.000000e+00> : vector<8x64xf32>
    %461 = tpu.matmul %460, %458, %cst_233 {dimension_numbers = #tpu.dot_dimension_numbers<[1], [0], [0], [1], [0, 0, 1, 1], [], []>} : vector<8x8xf32>, vector<8x64xf32>, vector<8x64xf32> -> vector<8x64xf32>
    %462 = arith.addf %442, %461 : vector<8x64xf32>
    %c0_234 = arith.constant 0 : index
    %c0_235 = arith.constant 0 : index
    %463 = vector.load %arg5[%c0_234, %c0_235] : memref<8x1xf32, #tpu.memory_space<vmem>>, vector<8x1xf32>
    %464 = vector.broadcast %463 : vector<8x1xf32> to vector<8x64xf32>
    %465 = arith.addf %462, %464 : vector<8x64xf32>
    %cst_236 = arith.constant 0.000000e+00 : f32
    %466 = vector.broadcast %cst_236 : f32 to vector<8x64xf32>
    %467 = arith.cmpf oge, %465, %466 : vector<8x64xf32>
    %cst_237 = arith.constant 2.000000e-01 : f32
    %468 = vector.broadcast %cst_237 : f32 to vector<8x64xf32>
    %469 = arith.mulf %468, %465 : vector<8x64xf32>
    %470 = arith.select %467, %465, %469 : vector<8x64xi1>, vector<8x64xf32>
    %c0_238 = arith.constant 0 : index
    %c0_239 = arith.constant 0 : index
    %471 = vector.load %arg11[%c0_238, %c0_239] : memref<64x256xf32, #tpu.memory_space<vmem>>, vector<64x256xf32>
    %cst_240 = arith.constant dense<0.000000e+00> : vector<8x256xf32>
    %472 = tpu.matmul %470, %471, %cst_240 {dimension_numbers = #tpu.dot_dimension_numbers<[1], [0], [0], [1], [0, 0, 1, 1], [], []>} : vector<8x64xf32>, vector<64x256xf32>, vector<8x256xf32> -> vector<8x256xf32>
    %473 = tpu.iota {dimensions = array<i32: 1>} : vector<1x16xi32>
    %474 = tpu.concatenate %473, %473, %473, %473, %473, %473, %473, %473, %473, %473, %473, %473, %473, %473, %473, %473 in 1 : vector<1x16xi32>, vector<1x16xi32>, vector<1x16xi32>, vector<1x16xi32>, vector<1x16xi32>, vector<1x16xi32>, vector<1x16xi32>, vector<1x16xi32>, vector<1x16xi32>, vector<1x16xi32>, vector<1x16xi32>, vector<1x16xi32>, vector<1x16xi32>, vector<1x16xi32>, vector<1x16xi32>, vector<1x16xi32> -> vector<1x256xi32>
    %cst_241 = arith.constant 0.000000e+00 : f32
    %475 = vector.broadcast %cst_241 : f32 to vector<3x256xf32>
    %cst_242 = arith.constant 0.000000e+00 : f32
    %476 = vector.broadcast %cst_242 : f32 to vector<8x17xf32>
    %477 = vector.extract_strided_slice %472 {offsets = [0, 0], sizes = [8, 239], strides = [1, 1]} : vector<8x256xf32> to vector<8x239xf32>
    %478 = tpu.concatenate %476, %477 in 1 : vector<8x17xf32>, vector<8x239xf32> -> vector<8x256xf32>
    %c-1_i32_243 = arith.constant -1 : i32
    %479 = vector.broadcast %c-1_i32_243 : i32 to vector<1x256xi32>
    %480 = arith.addi %474, %479 : vector<1x256xi32>
    %c0_i32_244 = arith.constant 0 : i32
    %481 = vector.broadcast %c0_i32_244 : i32 to vector<1x256xi32>
    %482 = arith.cmpi sge, %480, %481 : vector<1x256xi32>
    %c-1_i32_245 = arith.constant -1 : i32
    %483 = vector.broadcast %c-1_i32_245 : i32 to vector<1x256xi32>
    %484 = arith.addi %474, %483 : vector<1x256xi32>
    %c15_i32 = arith.constant 15 : i32
    %485 = vector.broadcast %c15_i32 : i32 to vector<1x256xi32>
    %486 = arith.cmpi sle, %484, %485 : vector<1x256xi32>
    %487 = arith.andi %482, %486 : vector<1x256xi1>
    %cst_246 = arith.constant 0.000000e+00 : f32
    %488 = vector.shape_cast %487 : vector<1x256xi1> to vector<1x256xi1>
    %489 = vector.broadcast %488 : vector<1x256xi1> to vector<8x256xi1>
    %490 = vector.broadcast %cst_246 : f32 to vector<8x256xf32>
    %491 = arith.select %489, %478, %490 : vector<8x256xi1>, vector<8x256xf32>
    %c0_247 = arith.constant 0 : index
    %c0_248 = arith.constant 0 : index
    %c0_249 = arith.constant 0 : index
    %492 = vector.load %arg6[%c0_247, %c0_248, %c0_249] : memref<9x3x8xf32, #tpu.memory_space<vmem>>, vector<1x3x8xf32>
    %493 = vector.shape_cast %492 : vector<1x3x8xf32> to vector<3x8xf32>
    %cst_250 = arith.constant dense<0.000000e+00> : vector<3x256xf32>
    %494 = tpu.matmul %493, %491, %cst_250 {dimension_numbers = #tpu.dot_dimension_numbers<[1], [0], [0], [1], [0, 0, 1, 1], [], []>} : vector<3x8xf32>, vector<8x256xf32>, vector<3x256xf32> -> vector<3x256xf32>
    %495 = arith.addf %475, %494 : vector<3x256xf32>
    %cst_251 = arith.constant 0.000000e+00 : f32
    %496 = vector.broadcast %cst_251 : f32 to vector<8x16xf32>
    %497 = vector.extract_strided_slice %472 {offsets = [0, 0], sizes = [8, 240], strides = [1, 1]} : vector<8x256xf32> to vector<8x240xf32>
    %498 = tpu.concatenate %496, %497 in 1 : vector<8x16xf32>, vector<8x240xf32> -> vector<8x256xf32>
    %c1_252 = arith.constant 1 : index
    %c0_253 = arith.constant 0 : index
    %c0_254 = arith.constant 0 : index
    %499 = vector.load %arg6[%c1_252, %c0_253, %c0_254] : memref<9x3x8xf32, #tpu.memory_space<vmem>>, vector<1x3x8xf32>
    %500 = vector.shape_cast %499 : vector<1x3x8xf32> to vector<3x8xf32>
    %cst_255 = arith.constant dense<0.000000e+00> : vector<3x256xf32>
    %501 = tpu.matmul %500, %498, %cst_255 {dimension_numbers = #tpu.dot_dimension_numbers<[1], [0], [0], [1], [0, 0, 1, 1], [], []>} : vector<3x8xf32>, vector<8x256xf32>, vector<3x256xf32> -> vector<3x256xf32>
    %502 = arith.addf %495, %501 : vector<3x256xf32>
    %cst_256 = arith.constant 0.000000e+00 : f32
    %503 = vector.broadcast %cst_256 : f32 to vector<8x15xf32>
    %504 = vector.extract_strided_slice %472 {offsets = [0, 0], sizes = [8, 241], strides = [1, 1]} : vector<8x256xf32> to vector<8x241xf32>
    %505 = tpu.concatenate %503, %504 in 1 : vector<8x15xf32>, vector<8x241xf32> -> vector<8x256xf32>
    %c1_i32_257 = arith.constant 1 : i32
    %506 = vector.broadcast %c1_i32_257 : i32 to vector<1x256xi32>
    %507 = arith.addi %474, %506 : vector<1x256xi32>
    %c0_i32_258 = arith.constant 0 : i32
    %508 = vector.broadcast %c0_i32_258 : i32 to vector<1x256xi32>
    %509 = arith.cmpi sge, %507, %508 : vector<1x256xi32>
    %c1_i32_259 = arith.constant 1 : i32
    %510 = vector.broadcast %c1_i32_259 : i32 to vector<1x256xi32>
    %511 = arith.addi %474, %510 : vector<1x256xi32>
    %c15_i32_260 = arith.constant 15 : i32
    %512 = vector.broadcast %c15_i32_260 : i32 to vector<1x256xi32>
    %513 = arith.cmpi sle, %511, %512 : vector<1x256xi32>
    %514 = arith.andi %509, %513 : vector<1x256xi1>
    %cst_261 = arith.constant 0.000000e+00 : f32
    %515 = vector.shape_cast %514 : vector<1x256xi1> to vector<1x256xi1>
    %516 = vector.broadcast %515 : vector<1x256xi1> to vector<8x256xi1>
    %517 = vector.broadcast %cst_261 : f32 to vector<8x256xf32>
    %518 = arith.select %516, %505, %517 : vector<8x256xi1>, vector<8x256xf32>
    %c2_262 = arith.constant 2 : index
    %c0_263 = arith.constant 0 : index
    %c0_264 = arith.constant 0 : index
    %519 = vector.load %arg6[%c2_262, %c0_263, %c0_264] : memref<9x3x8xf32, #tpu.memory_space<vmem>>, vector<1x3x8xf32>
    %520 = vector.shape_cast %519 : vector<1x3x8xf32> to vector<3x8xf32>
    %cst_265 = arith.constant dense<0.000000e+00> : vector<3x256xf32>
    %521 = tpu.matmul %520, %518, %cst_265 {dimension_numbers = #tpu.dot_dimension_numbers<[1], [0], [0], [1], [0, 0, 1, 1], [], []>} : vector<3x8xf32>, vector<8x256xf32>, vector<3x256xf32> -> vector<3x256xf32>
    %522 = arith.addf %502, %521 : vector<3x256xf32>
    %cst_266 = arith.constant 0.000000e+00 : f32
    %523 = vector.broadcast %cst_266 : f32 to vector<8x1xf32>
    %524 = vector.extract_strided_slice %472 {offsets = [0, 0], sizes = [8, 255], strides = [1, 1]} : vector<8x256xf32> to vector<8x255xf32>
    %525 = tpu.concatenate %523, %524 in 1 : vector<8x1xf32>, vector<8x255xf32> -> vector<8x256xf32>
    %c-1_i32_267 = arith.constant -1 : i32
    %526 = vector.broadcast %c-1_i32_267 : i32 to vector<1x256xi32>
    %527 = arith.addi %474, %526 : vector<1x256xi32>
    %c0_i32_268 = arith.constant 0 : i32
    %528 = vector.broadcast %c0_i32_268 : i32 to vector<1x256xi32>
    %529 = arith.cmpi sge, %527, %528 : vector<1x256xi32>
    %c-1_i32_269 = arith.constant -1 : i32
    %530 = vector.broadcast %c-1_i32_269 : i32 to vector<1x256xi32>
    %531 = arith.addi %474, %530 : vector<1x256xi32>
    %c15_i32_270 = arith.constant 15 : i32
    %532 = vector.broadcast %c15_i32_270 : i32 to vector<1x256xi32>
    %533 = arith.cmpi sle, %531, %532 : vector<1x256xi32>
    %534 = arith.andi %529, %533 : vector<1x256xi1>
    %cst_271 = arith.constant 0.000000e+00 : f32
    %535 = vector.shape_cast %534 : vector<1x256xi1> to vector<1x256xi1>
    %536 = vector.broadcast %535 : vector<1x256xi1> to vector<8x256xi1>
    %537 = vector.broadcast %cst_271 : f32 to vector<8x256xf32>
    %538 = arith.select %536, %525, %537 : vector<8x256xi1>, vector<8x256xf32>
    %c3_272 = arith.constant 3 : index
    %c0_273 = arith.constant 0 : index
    %c0_274 = arith.constant 0 : index
    %539 = vector.load %arg6[%c3_272, %c0_273, %c0_274] : memref<9x3x8xf32, #tpu.memory_space<vmem>>, vector<1x3x8xf32>
    %540 = vector.shape_cast %539 : vector<1x3x8xf32> to vector<3x8xf32>
    %cst_275 = arith.constant dense<0.000000e+00> : vector<3x256xf32>
    %541 = tpu.matmul %540, %538, %cst_275 {dimension_numbers = #tpu.dot_dimension_numbers<[1], [0], [0], [1], [0, 0, 1, 1], [], []>} : vector<3x8xf32>, vector<8x256xf32>, vector<3x256xf32> -> vector<3x256xf32>
    %542 = arith.addf %522, %541 : vector<3x256xf32>
    %c4_276 = arith.constant 4 : index
    %c0_277 = arith.constant 0 : index
    %c0_278 = arith.constant 0 : index
    %543 = vector.load %arg6[%c4_276, %c0_277, %c0_278] : memref<9x3x8xf32, #tpu.memory_space<vmem>>, vector<1x3x8xf32>
    %544 = vector.shape_cast %543 : vector<1x3x8xf32> to vector<3x8xf32>
    %cst_279 = arith.constant dense<0.000000e+00> : vector<3x256xf32>
    %545 = tpu.matmul %544, %472, %cst_279 {dimension_numbers = #tpu.dot_dimension_numbers<[1], [0], [0], [1], [0, 0, 1, 1], [], []>} : vector<3x8xf32>, vector<8x256xf32>, vector<3x256xf32> -> vector<3x256xf32>
    %546 = arith.addf %542, %545 : vector<3x256xf32>
    %cst_280 = arith.constant 0.000000e+00 : f32
    %547 = vector.broadcast %cst_280 : f32 to vector<8x1xf32>
    %548 = vector.extract_strided_slice %472 {offsets = [0, 1], sizes = [8, 255], strides = [1, 1]} : vector<8x256xf32> to vector<8x255xf32>
    %549 = tpu.concatenate %548, %547 in 1 : vector<8x255xf32>, vector<8x1xf32> -> vector<8x256xf32>
    %c1_i32_281 = arith.constant 1 : i32
    %550 = vector.broadcast %c1_i32_281 : i32 to vector<1x256xi32>
    %551 = arith.addi %474, %550 : vector<1x256xi32>
    %c0_i32_282 = arith.constant 0 : i32
    %552 = vector.broadcast %c0_i32_282 : i32 to vector<1x256xi32>
    %553 = arith.cmpi sge, %551, %552 : vector<1x256xi32>
    %c1_i32_283 = arith.constant 1 : i32
    %554 = vector.broadcast %c1_i32_283 : i32 to vector<1x256xi32>
    %555 = arith.addi %474, %554 : vector<1x256xi32>
    %c15_i32_284 = arith.constant 15 : i32
    %556 = vector.broadcast %c15_i32_284 : i32 to vector<1x256xi32>
    %557 = arith.cmpi sle, %555, %556 : vector<1x256xi32>
    %558 = arith.andi %553, %557 : vector<1x256xi1>
    %cst_285 = arith.constant 0.000000e+00 : f32
    %559 = vector.shape_cast %558 : vector<1x256xi1> to vector<1x256xi1>
    %560 = vector.broadcast %559 : vector<1x256xi1> to vector<8x256xi1>
    %561 = vector.broadcast %cst_285 : f32 to vector<8x256xf32>
    %562 = arith.select %560, %549, %561 : vector<8x256xi1>, vector<8x256xf32>
    %c5_286 = arith.constant 5 : index
    %c0_287 = arith.constant 0 : index
    %c0_288 = arith.constant 0 : index
    %563 = vector.load %arg6[%c5_286, %c0_287, %c0_288] : memref<9x3x8xf32, #tpu.memory_space<vmem>>, vector<1x3x8xf32>
    %564 = vector.shape_cast %563 : vector<1x3x8xf32> to vector<3x8xf32>
    %cst_289 = arith.constant dense<0.000000e+00> : vector<3x256xf32>
    %565 = tpu.matmul %564, %562, %cst_289 {dimension_numbers = #tpu.dot_dimension_numbers<[1], [0], [0], [1], [0, 0, 1, 1], [], []>} : vector<3x8xf32>, vector<8x256xf32>, vector<3x256xf32> -> vector<3x256xf32>
    %566 = arith.addf %546, %565 : vector<3x256xf32>
    %cst_290 = arith.constant 0.000000e+00 : f32
    %567 = vector.broadcast %cst_290 : f32 to vector<8x15xf32>
    %568 = vector.extract_strided_slice %472 {offsets = [0, 15], sizes = [8, 241], strides = [1, 1]} : vector<8x256xf32> to vector<8x241xf32>
    %569 = tpu.concatenate %568, %567 in 1 : vector<8x241xf32>, vector<8x15xf32> -> vector<8x256xf32>
    %c-1_i32_291 = arith.constant -1 : i32
    %570 = vector.broadcast %c-1_i32_291 : i32 to vector<1x256xi32>
    %571 = arith.addi %474, %570 : vector<1x256xi32>
    %c0_i32_292 = arith.constant 0 : i32
    %572 = vector.broadcast %c0_i32_292 : i32 to vector<1x256xi32>
    %573 = arith.cmpi sge, %571, %572 : vector<1x256xi32>
    %c-1_i32_293 = arith.constant -1 : i32
    %574 = vector.broadcast %c-1_i32_293 : i32 to vector<1x256xi32>
    %575 = arith.addi %474, %574 : vector<1x256xi32>
    %c15_i32_294 = arith.constant 15 : i32
    %576 = vector.broadcast %c15_i32_294 : i32 to vector<1x256xi32>
    %577 = arith.cmpi sle, %575, %576 : vector<1x256xi32>
    %578 = arith.andi %573, %577 : vector<1x256xi1>
    %cst_295 = arith.constant 0.000000e+00 : f32
    %579 = vector.shape_cast %578 : vector<1x256xi1> to vector<1x256xi1>
    %580 = vector.broadcast %579 : vector<1x256xi1> to vector<8x256xi1>
    %581 = vector.broadcast %cst_295 : f32 to vector<8x256xf32>
    %582 = arith.select %580, %569, %581 : vector<8x256xi1>, vector<8x256xf32>
    %c6_296 = arith.constant 6 : index
    %c0_297 = arith.constant 0 : index
    %c0_298 = arith.constant 0 : index
    %583 = vector.load %arg6[%c6_296, %c0_297, %c0_298] : memref<9x3x8xf32, #tpu.memory_space<vmem>>, vector<1x3x8xf32>
    %584 = vector.shape_cast %583 : vector<1x3x8xf32> to vector<3x8xf32>
    %cst_299 = arith.constant dense<0.000000e+00> : vector<3x256xf32>
    %585 = tpu.matmul %584, %582, %cst_299 {dimension_numbers = #tpu.dot_dimension_numbers<[1], [0], [0], [1], [0, 0, 1, 1], [], []>} : vector<3x8xf32>, vector<8x256xf32>, vector<3x256xf32> -> vector<3x256xf32>
    %586 = arith.addf %566, %585 : vector<3x256xf32>
    %cst_300 = arith.constant 0.000000e+00 : f32
    %587 = vector.broadcast %cst_300 : f32 to vector<8x16xf32>
    %588 = vector.extract_strided_slice %472 {offsets = [0, 16], sizes = [8, 240], strides = [1, 1]} : vector<8x256xf32> to vector<8x240xf32>
    %589 = tpu.concatenate %588, %587 in 1 : vector<8x240xf32>, vector<8x16xf32> -> vector<8x256xf32>
    %c7_301 = arith.constant 7 : index
    %c0_302 = arith.constant 0 : index
    %c0_303 = arith.constant 0 : index
    %590 = vector.load %arg6[%c7_301, %c0_302, %c0_303] : memref<9x3x8xf32, #tpu.memory_space<vmem>>, vector<1x3x8xf32>
    %591 = vector.shape_cast %590 : vector<1x3x8xf32> to vector<3x8xf32>
    %cst_304 = arith.constant dense<0.000000e+00> : vector<3x256xf32>
    %592 = tpu.matmul %591, %589, %cst_304 {dimension_numbers = #tpu.dot_dimension_numbers<[1], [0], [0], [1], [0, 0, 1, 1], [], []>} : vector<3x8xf32>, vector<8x256xf32>, vector<3x256xf32> -> vector<3x256xf32>
    %593 = arith.addf %586, %592 : vector<3x256xf32>
    %cst_305 = arith.constant 0.000000e+00 : f32
    %594 = vector.broadcast %cst_305 : f32 to vector<8x17xf32>
    %595 = vector.extract_strided_slice %472 {offsets = [0, 17], sizes = [8, 239], strides = [1, 1]} : vector<8x256xf32> to vector<8x239xf32>
    %596 = tpu.concatenate %595, %594 in 1 : vector<8x239xf32>, vector<8x17xf32> -> vector<8x256xf32>
    %c1_i32_306 = arith.constant 1 : i32
    %597 = vector.broadcast %c1_i32_306 : i32 to vector<1x256xi32>
    %598 = arith.addi %474, %597 : vector<1x256xi32>
    %c0_i32_307 = arith.constant 0 : i32
    %599 = vector.broadcast %c0_i32_307 : i32 to vector<1x256xi32>
    %600 = arith.cmpi sge, %598, %599 : vector<1x256xi32>
    %c1_i32_308 = arith.constant 1 : i32
    %601 = vector.broadcast %c1_i32_308 : i32 to vector<1x256xi32>
    %602 = arith.addi %474, %601 : vector<1x256xi32>
    %c15_i32_309 = arith.constant 15 : i32
    %603 = vector.broadcast %c15_i32_309 : i32 to vector<1x256xi32>
    %604 = arith.cmpi sle, %602, %603 : vector<1x256xi32>
    %605 = arith.andi %600, %604 : vector<1x256xi1>
    %cst_310 = arith.constant 0.000000e+00 : f32
    %606 = vector.shape_cast %605 : vector<1x256xi1> to vector<1x256xi1>
    %607 = vector.broadcast %606 : vector<1x256xi1> to vector<8x256xi1>
    %608 = vector.broadcast %cst_310 : f32 to vector<8x256xf32>
    %609 = arith.select %607, %596, %608 : vector<8x256xi1>, vector<8x256xf32>
    %c8_311 = arith.constant 8 : index
    %c0_312 = arith.constant 0 : index
    %c0_313 = arith.constant 0 : index
    %610 = vector.load %arg6[%c8_311, %c0_312, %c0_313] : memref<9x3x8xf32, #tpu.memory_space<vmem>>, vector<1x3x8xf32>
    %611 = vector.shape_cast %610 : vector<1x3x8xf32> to vector<3x8xf32>
    %cst_314 = arith.constant dense<0.000000e+00> : vector<3x256xf32>
    %612 = tpu.matmul %611, %609, %cst_314 {dimension_numbers = #tpu.dot_dimension_numbers<[1], [0], [0], [1], [0, 0, 1, 1], [], []>} : vector<3x8xf32>, vector<8x256xf32>, vector<3x256xf32> -> vector<3x256xf32>
    %613 = arith.addf %593, %612 : vector<3x256xf32>
    %c0_315 = arith.constant 0 : index
    %c0_316 = arith.constant 0 : index
    %614 = vector.load %arg7[%c0_315, %c0_316] : memref<3x1xf32, #tpu.memory_space<vmem>>, vector<3x1xf32>
    %615 = vector.broadcast %614 : vector<3x1xf32> to vector<3x256xf32>
    %616 = arith.addf %613, %615 : vector<3x256xf32>
    %c0_317 = arith.constant 0 : index
    %c0_318 = arith.constant 0 : index
    %c0_319 = arith.constant 0 : index
    %617 = vector.load %arg12[%c0_317, %c0_318, %c0_319] : memref<1x3x256xf32, #tpu.memory_space<vmem>>, vector<1x3x256xf32>
    %618 = vector.shape_cast %617 : vector<1x3x256xf32> to vector<3x256xf32>
    %619 = vector.shape_cast %616 : vector<3x256xf32> to vector<1x3x256xf32>
    tpu.vector_store %arg12[%c0_317, %c0_318, %c0_319], %619 {strides = array<i32>} : memref<1x3x256xf32, #tpu.memory_space<vmem>>, vector<1x3x256xf32>,
    return
  }
  func.func @transform_0(%arg0: i32) -> (i32, i32, i32) {
    %c0_i32 = arith.constant 0 : i32
    %c0_i32_0 = arith.constant 0 : i32
    %c0_i32_1 = arith.constant 0 : i32
    return %arg0, %c0_i32, %c0_i32_0 : i32, i32, i32
  }
  func.func @transform_1(%arg0: i32) -> (i32, i32, i32) {
    %c0_i32 = arith.constant 0 : i32
    %c0_i32_0 = arith.constant 0 : i32
    %c0_i32_1 = arith.constant 0 : i32
    %c0_i32_2 = arith.constant 0 : i32
    return %c0_i32, %c0_i32_0, %c0_i32_1 : i32, i32, i32
  }
  func.func @transform_2(%arg0: i32) -> (i32, i32) {
    %c0_i32 = arith.constant 0 : i32
    %c0_i32_0 = arith.constant 0 : i32
    %c0_i32_1 = arith.constant 0 : i32
    return %c0_i32, %c0_i32_0 : i32, i32
  }
  func.func @transform_3(%arg0: i32) -> (i32, i32, i32) {
    %c0_i32 = arith.constant 0 : i32
    %c0_i32_0 = arith.constant 0 : i32
    %c0_i32_1 = arith.constant 0 : i32
    %c0_i32_2 = arith.constant 0 : i32
    return %c0_i32, %c0_i32_0, %c0_i32_1 : i32, i32, i32
  }
  func.func @transform_4(%arg0: i32) -> (i32, i32) {
    %c0_i32 = arith.constant 0 : i32
    %c0_i32_0 = arith.constant 0 : i32
    %c0_i32_1 = arith.constant 0 : i32
    return %c0_i32, %c0_i32_0 : i32, i32
  }
  func.func @transform_5(%arg0: i32) -> (i32, i32, i32) {
    %c0_i32 = arith.constant 0 : i32
    %c0_i32_0 = arith.constant 0 : i32
    %c0_i32_1 = arith.constant 0 : i32
    %c0_i32_2 = arith.constant 0 : i32
    return %c0_i32, %c0_i32_0, %c0_i32_1 : i32, i32, i32
  }
  func.func @transform_6(%arg0: i32) -> (i32, i32) {
    %c0_i32 = arith.constant 0 : i32
    %c0_i32_0 = arith.constant 0 : i32
    %c0_i32_1 = arith.constant 0 : i32
    return %c0_i32, %c0_i32_0 : i32, i32
  }
  func.func @transform_7(%arg0: i32) -> (i32, i32) {
    %c0_i32 = arith.constant 0 : i32
    %c0_i32_0 = arith.constant 0 : i32
    %c0_i32_1 = arith.constant 0 : i32
    return %c0_i32, %c0_i32_0 : i32, i32
  }
  func.func @transform_8(%arg0: i32) -> (i32, i32) {
    %c0_i32 = arith.constant 0 : i32
    %c0_i32_0 = arith.constant 0 : i32
    %c0_i32_1 = arith.constant 0 : i32
    return %c0_i32, %c0_i32_0 : i32, i32
  }
  func.func @transform_9(%arg0: i32) -> (i32, i32) {
    %c0_i32 = arith.constant 0 : i32
    %c0_i32_0 = arith.constant 0 : i32
    %c0_i32_1 = arith.constant 0 : i32
    return %c0_i32, %c0_i32_0 : i32, i32
  }
  func.func @transform_10(%arg0: i32) -> (i32, i32) {
    %c0_i32 = arith.constant 0 : i32
    %c0_i32_0 = arith.constant 0 : i32
    %c0_i32_1 = arith.constant 0 : i32
    return %c0_i32, %c0_i32_0 : i32, i32
  }
  func.func @transform_11(%arg0: i32) -> (i32, i32, i32) {
    %c0_i32 = arith.constant 0 : i32
    %c0_i32_0 = arith.constant 0 : i32
    %c0_i32_1 = arith.constant 0 : i32
    return %arg0, %c0_i32, %c0_i32_0 : i32, i32, i32
  }
}

</mosaic_0001>

<bundles_post_ra>
// kernel: sln_ae_forward.1
= control target key start
LH: loop header
LB: loop body
LE: loop exit
PB: predicated region body
PF: predicated region fallthrough
CT: control target
= control target key end

     0   :  { %s4524_s17 = smov 0   ;;  %s5250_s0 = inlined_call_operand.vmem [shape: f32[2,4,256], index: 0, kind: input, shape index: {}]   ;;  %s5251_s1 = inlined_call_operand.vmem [shape: f32[9,8,4], index: 1, kind: input, shape index: {}]   ;;  %s5252_s2 = inlined_call_operand.vmem [shape: f32[8,1], index: 2, kind: input, shape index: {}]   ;;  %s5253_s3 = inlined_call_operand.vmem [shape: f32[9,8,8], index: 3, kind: input, shape index: {}]   ;;  %s5254_s4 = inlined_call_operand.vmem [shape: f32[8,1], index: 4, kind: input, shape index: {}]   ;;  %s5255_s5 = inlined_call_operand.vmem [shape: f32[9,3,8], index: 5, kind: input, shape index: {}]   ;;  %s5256_s6 = inlined_call_operand.vmem [shape: f32[3,1], index: 6, kind: input, shape index: {}]   ;;  %s5257_s7 = inlined_call_operand.vmem [shape: f32[256,64], index: 7, kind: input, shape index: {}]   ;;  %s5258_s8 = inlined_call_operand.vmem [shape: f32[64,16], index: 8, kind: input, shape index: {}]   ;;  %s5259_s9 = inlined_call_operand.vmem [shape: f32[16,64], index: 9, kind: input, shape index: {}]   ;;  %s5260_s10 = inlined_call_operand.vmem [shape: f32[64,256], index: 10, kind: input, shape index: {}]   ;;  %s5261_s11 = inlined_call_operand.vmem [shape: f32[2,3,256], index: 11, kind: output, shape index: {}]  }
   0x1 LB: > { %s3920_s18 = sadd.s32 4294967295, %s4429_s17   ;;  %p3924_p0 = scmp.ge.s32.totalorder %s4429_s17, 1  ;;  %s4429_s17 = sphi %s4524_s17, %s21_s17  }
   0x2   : > { %p337_p1 = scmp.lt.s32.totalorder %s4429_s17, 3 }
   0x4   : > { %p338_p2 = pnand %p3924_p0, %p337_p1 }
   0x5   : > { %p377_p3 = scmp.lt.s32.totalorder (!%p338_p2), %s3920_s18, 1  ;;  %s4431_s23 = smov (!%p338_p2), 127   ;;  %v404_v2 = vld [vmem:[%s5257_s7 + $0x80] sm:$0xff] (!%p338_p2)  ;;  %v405_v3 = vld [vmem:[%s5257_s7 + $0x88] sm:$0xff] (!%p338_p2)  ;;  %v406_v7 = vld [vmem:[%s5257_s7 + $0x90] sm:$0xff] (!%p338_p2)  ;;  %vm5265_vm0 = vcmask (!%p338_p2), 1039360   ;;  %v521_v56 = vlaneseq (!%p338_p2) }
   0x6   : > { %341 = sbr.rel (%p338_p2) target bundleno = 2832 (0xb10), region = 64  ;;  %v388_v4 = vld [vmem:[%s5257_s7] sm:$0xff] (!%p338_p2)  ;;  %v4300_v5 = vpack.c.bf16 (!%p338_p2), %v405_v3, %v404_v2  ;;  %v389_v6 = vld [vmem:[%s5257_s7 + $0x8] sm:$0xff] (!%p338_p2)  ;;  %v407_v8 = vld [vmem:[%s5257_s7 + $0x98] sm:$0xff] (!%p338_p2)  ;;  %s4432_s28 = smov (!%p338_p2), 112   ;;  %vm5266_vm1 = vcmask (!%p338_p2), 916480  }
   0x7   : > { %v4302_v9 = vpack.c.bf16 (!%p338_p2), %v389_v6, %v388_v4  ;;  %v4304_v10 = vpack.c.bf16 (!%p338_p2), %v407_v8, %v406_v7  ;;  %v390_v11 = vld [vmem:[%s5257_s7 + $0x10] sm:$0xff] (!%p338_p2)  ;;  %v391_v12 = vld [vmem:[%s5257_s7 + $0x18] sm:$0xff] (!%p338_p2)  ;;  %v408_v13 = vld [vmem:[%s5257_s7 + $0xa0] sm:$0xff] (!%p338_p2)  ;;  %v4648_v57 = vand.u32 (!%p338_p2), 127, %v521_v56  ;;  %s4433_s29 = smov (!%p338_p2), 8   ;;  %s4434_s30 = smov (!%p338_p2), 24  }
   0x8   : > { %4301 = vmatprep.subr.bf16.mxu0 (!%p338_p2), %v4300_v5  ;;  %v409_v14 = vld [vmem:[%s5257_s7 + $0xa8] sm:$0xff] (!%p338_p2)  ;;  %v4306_v15 = vpack.c.bf16 (!%p338_p2), %v391_v12, %v390_v11  ;;  %v392_v17 = vld [vmem:[%s5257_s7 + $0x20] sm:$0xff] (!%p338_p2)  ;;  %v410_v19 = vld [vmem:[%s5257_s7 + $0xb0] sm:$0xff] (!%p338_p2)  ;;  %s5263_s12 = smov (!%p338_p2), 16   ;;  %s4436_s13 = smov (!%p338_p2), 40   ;;  %vm539_vm2 = vcmask (!%p338_p2), 130048  }
   0x9   : > { %4303 = vmatpush3.bf16.msra.mxu0 (!%p338_p2), %v4302_v9  ;;  %v4308_v16 = vpack.c.bf16 (!%p338_p2), %v409_v14, %v408_v13  ;;  %v393_v18 = vld [vmem:[%s5257_s7 + $0x28] sm:$0xff] (!%p338_p2)  ;;  %v411_v20 = vld [vmem:[%s5257_s7 + $0xb8] sm:$0xff] (!%p338_p2)  ;;  %v394_v23 = vld [vmem:[%s5257_s7 + $0x30] sm:$0xff] (!%p338_p2)  ;;  %s4437_s14 = smov (!%p338_p2), 32   ;;  %s4438_s15 = smov (!%p338_p2), 56   ;;  %vm543_vm3 = vcmask (!%p338_p2), 261120  }
   0xa   : > { %4305 = vmatprep.subr.bf16.mxu0 (!%p338_p2), %v4304_v10  ;;  %v4310_v21 = vpack.c.bf16 (!%p338_p2), %v393_v18, %v392_v17  ;;  %v4312_v22 = vpack.c.bf16 (!%p338_p2), %v411_v20, %v410_v19  ;;  %v395_v24 = vld [vmem:[%s5257_s7 + $0x38] sm:$0xff] (!%p338_p2)  ;;  %v412_v25 = vld [vmem:[%s5257_s7 + $0xc0] sm:$0xff] (!%p338_p2)  ;;  %v413_v26 = vld [vmem:[%s5257_s7 + $0xc8] sm:$0xff] (!%p338_p2)  ;;  %s4439_s16 = smov (!%p338_p2), 48   ;;  %v4440_v4 = vmov (!%p338_p2), 0   ;;  %vm547_vm4 = vcmask (!%p338_p2), 392192  }
   0xb   : > { %v4314_v27 = vpack.c.bf16 (!%p338_p2), %v395_v24, %v394_v23  ;;  %v4316_v28 = vpack.c.bf16 (!%p338_p2), %v413_v26, %v412_v25  ;;  %v396_v29 = vld [vmem:[%s5257_s7 + $0x40] sm:$0xff] (!%p338_p2)  ;;  %v397_v30 = vld [vmem:[%s5257_s7 + $0x48] sm:$0xff] (!%p338_p2)  ;;  %v414_v32 = vld [vmem:[%s5257_s7 + $0xd0] sm:$0xff] (!%p338_p2)  ;;  %4420 = vset.pattern.permute.xlu1 (!%p338_p2), %v4440_v4  ;;  %4421 = vset.pattern.permute.xlu0 (!%p338_p2), %v4440_v4  ;;  %v4441_v9 = vmov (!%p338_p2), 0.0   ;;  %vm4442_vm5 = vmmov (!%p338_p2), 0   ;;  %s4443_s20 = smov (!%p338_p2), 7  }
   0xc   : > { %v4318_v31 = vpack.c.bf16 (!%p338_p2), %v397_v30, %v396_v29  ;;  %v415_v33 = vld [vmem:[%s5257_s7 + $0xd8] sm:$0xff] (!%p338_p2)  ;;  %v398_v35 = vld [vmem:[%s5257_s7 + $0x50] sm:$0xff] (!%p338_p2)  ;;  %v416_v38 = vld [vmem:[%s5257_s7 + $0xe0] sm:$0xff] (!%p338_p2)  ;;  %4144 = vmatprep.subr.mxu1 (!%p338_p2), %v4441_v9  ;;  %4146 = vmatprep.mubr.msk.f32.mxu1 (!%p338_p2), %vm4442_vm5, %v4441_v9  ;;  %s4444_s21 = smov (!%p338_p2), 9   ;;  %s4446_s24 = smov (!%p338_p2), 121   ;;  %vm537_vm6 = vcmask (!%p338_p2), 64512  }
   0xd   : > { %s5302_s18 = smov (!%p377_p3, %s3920_s18), 1  ;;  %4307 = vmatpush3.bf16.msra.mxu0 %v4306_v15  ;;  %v4320_v34 = vpack.c.bf16 %v415_v33, %v414_v32  ;;  %v399_v36 = vld [vmem:[%s5257_s7 + $0x58] sm:$0xff]  ;;  %v417_v39 = vld [vmem:[%s5257_s7 + $0xe8] sm:$0xff]  ;;  %v400_v41 = vld [vmem:[%s5257_s7 + $0x60] sm:$0xff]  ;;  %s4447_s25 = smov 119   ;;  %vm541_vm7 = vcmask 195584  }
   0xe   : > { %s5262_s19 = sshll.u32 %s5302_s18, 3  ;;  %4309 = vmatprep.subr.bf16.mxu0 %v4308_v16  ;;  %v4322_v37 = vpack.c.bf16 %v399_v36, %v398_v35  ;;  %v4324_v40 = vpack.c.bf16 %v417_v39, %v416_v38  ;;  %v401_v42 = vld [vmem:[%s5257_s7 + $0x68] sm:$0xff]  ;;  %v418_v45 = vld [vmem:[%s5257_s7 + $0xf0] sm:$0xff]  ;;  %v419_v46 = vld [vmem:[%s5257_s7 + $0xf8] sm:$0xff]  ;;  %s4448_s26 = smov 120   ;;  %vm545_vm8 = vcmask 326656  }
   0xf   : > { %s381_s22 = scalar_lea.vmem %s5250_s0, %s5262_s19  ;;  %v4326_v44 = vpack.c.bf16 %v401_v42, %v400_v41  ;;  %v402_v47 = vld [vmem:[%s5257_s7 + $0x70] sm:$0xff]  ;;  %v4328_v48 = vpack.c.bf16 %v419_v46, %v418_v45  ;;  %v403_v49 = vld [vmem:[%s5257_s7 + $0x78] sm:$0xff]  ;;  %v1325_v13 = vld [vmem:[%s5252_s2] sm:$0xff]  ;;  %vm5269_vm9 = vcmask 457728   ;;  %s4450_s19 = smov 4  }
  0x10   : > { %v4540_v0 = vld [vmem:[%s381_s22] sm:$0xff]  ;;  %v4330_v51 = vpack.c.bf16 %v403_v49, %v402_v47  ;;  %s4445_s22 = smov 1   ;;  %v3934_v47 = vld [vmem:[%s5251_s1 + $0x10] sm:$0xff]  ;;  %v3937_v49 = vld [vmem:[%s5251_s1 + $0x18] sm:$0xff]  ;;  %s4453_s27 = smov 3  }
  0x11   : > { %422 = vrot.lane.b32.xlu0 %v4540_v0, %s4431_s23  ;;  %v421_v1 = vcombine.high %v4540_v0, %v4540_v0  ;;  %4311 = vmatpush3.bf16.msra.mxu0 %v4310_v21  ;;  %v568_v38 = vld [vmem:[%s5251_s1] sm:$0xff]  ;;  %v2948_v35 = vld [vmem:[%s5260_s10 + $0x8] sm:$0xff] }
  0x12   : > { %4313 = vmatprep.subr.bf16.mxu0 %v4312_v22 }
  0x15   : > { %424 = vrot.lane.b32.xlu0 %v421_v1, %s4431_s23  ;;  %4315 = vmatpush3.bf16.msra.mxu0 %v4314_v27  ;;  %v563_v27 = vshrl.u32 %v521_v56, 7  ;;  %v3943_v56 = vld [vmem:[%s5251_s1 + $0x28] sm:$0xff] }
  0x16   : > { %4317 = vmatprep.subr.bf16.mxu0 %v4316_v28 }
  0x17   : > { %v4707_v28 = vsub.s32 0, %v563_v27 }
  0x19   : > { %4319 = vmatpush3.bf16.msra.mxu0 %v4318_v31  ;;  %523 = vrot.lane.b32.xlu0 %v4648_v57, %s4433_s29 }
  0x1a   : > { %4321 = vmatprep.subr.bf16.mxu0 %v4320_v34 }
  0x1d   : > { %4323 = vmatpush3.bf16.msra.mxu0 %v4322_v37  ;;  %527 = vrot.lane.b32.xlu0 %v4648_v57, %s4434_s30  ;;  %s4454_s30 = smov 125  }
  0x1e   : > { %4325 = vmatprep.subr.bf16.mxu0 %v4324_v40 }
  0x21   : > { %4327 = vmatpush3.bf16.msra.mxu0 %v4326_v44  ;;  %531 = vrot.lane.b32.xlu0 %v4648_v57, %s4436_s13  ;;  %v3929_v44 = vld [vmem:[%s5251_s1 + $0x8] sm:$0xff]  ;;  %s4455_s13 = smov 123  }
  0x22   : > { %4329 = vmatprep.subr.bf16.mxu0 %v4328_v48 }
  0x25   : > { %4331 = vmatpush3.bf16.msra.mxu0 %v4330_v51  ;;  %535 = vrot.lane.b32.xlu0 %v4648_v57, %s4438_s15  ;;  %s4461_s15 = smov 15  }
  0x26   : > { %4139 = vmatprep.subr.mxu0 %v4441_v9 }
  0x83   : > { %v423_v43 = vpop.permute.xlu0 %422 }
  0x87   : > { %v425_v50 = vpop.permute.xlu0 %424 }
  0x88   : > { %v427_v52 = vsel %vm5265_vm0, %v423_v43, %v425_v50  ;;  %v429_v53 = vsel %vm5265_vm0, %v425_v50, 0.0  ;;  %vm1435_vm0 = vcmask 97280  }
  0x89   : > { %v431_v54 = vcombine.low %v427_v52, %v429_v53  ;;  %v3940_v52 = vld [vmem:[%s5251_s1 + $0x20] sm:$0xff] }
  0x8b   : > { %v433_v55 = vmax.f32 %v4540_v0, %v431_v54  ;;  %v4697_v14 = vpop.permute.xlu0 %523 }
  0x8c   : > { %v538_v15 = vsel %vm537_vm6, %v4648_v57, %v4697_v14 }
  0x8d   : > { %436 = vrot.lane.b32.xlu1 %v433_v55, %s4432_s28  ;;  %v435_v58 = vcombine.high %v433_v55, %v433_v55 }
  0x8f   : > { %v528_v17 = vpop.permute.xlu0 %527 }
  0x91   : > { %438 = vrot.lane.b32.xlu1 %v435_v58, %s4432_s28 }
  0x93   : > { %v532_v20 = vpop.permute.xlu0 %531 }
  0x95   : > { %525 = vrot.lane.b32.xlu1 %v4648_v57, %s5263_s12  ;;  %s4452_s12 = smov 5  }
  0x97   : > { %v536_v23 = vpop.permute.xlu0 %535 }
  0x99   : > { %529 = vrot.lane.b32.xlu1 %v4648_v57, %s4437_s14  ;;  %s4451_s14 = smov 12  }
  0x9d   : > { %533 = vrot.lane.b32.xlu1 %v4648_v57, %s4439_s16  ;;  %s4462_s16 = smov 113  }
  0xff   : > { %v437_v59 = vpop.permute.xlu1 %436 }
 0x103   : > { %v439_v60 = vpop.permute.xlu1 %438 }
 0x104   : > { %v441_v61 = vsel %vm5266_vm1, %v437_v59, %v439_v60  ;;  %v443_v62 = vsel %vm5266_vm1, %v439_v60, 0.0  ;;  %v3946_v60 = vld [vmem:[%s5251_s1 + $0x30] sm:$0xff] }
 0x105   : > { %v445_v63 = vcombine.low %v441_v61, %v443_v62 }
 0x107   : > { %v447_v0 = vmax.f32 %v433_v55, %v445_v63  ;;  %v526_v2 = vpop.permute.xlu1 %525 }
 0x108   : > { %v3045_v3 = vsel %vm539_vm2, %v4648_v57, %v526_v2  ;;  %v540_v16 = vsel %vm539_vm2, %v538_v15, %v526_v2  ;;  %v3952_v2 = vld [vmem:[%s5251_s1 + $0x40] sm:$0xff] }
 0x109   : > { %v449_v1 = vcombine.high %v447_v0, %v447_v0  ;;  %v542_v18 = vsel %vm541_vm7, %v540_v16, %v528_v17  ;;  %vm579_vm7 = vcmask 1043456  }
 0x10b   : > { %515 = vmatprep.mubr.f32.mxu0 %v449_v1  ;;  %v530_v5 = vpop.permute.xlu1 %529 }
 0x10c   : > { %516 = vmatmul.mubr.f32.vlgmr.msra.gmra.mrb[0].mxu0 %v447_v0  ;;  %v3046_v6 = vsel %vm543_vm3, %v3045_v3, %v530_v5  ;;  %v544_v19 = vsel %vm543_vm3, %v542_v18, %v530_v5  ;;  %vm5272_vm3 = vcmask 72704   ;;  %v3949_v0 = vld [vmem:[%s5251_s1 + $0x38] sm:$0xff] }
 0x10d   : > { %4141 = vmatprep.mubr.msk.f32.mxu0 %vm4442_vm5, %v4441_v9  ;;  %v546_v21 = vsel %vm545_vm8, %v544_v19, %v532_v20 }
 0x10f   : > { %v534_v7 = vpop.permute.xlu1 %533 }
 0x110   : > { %v4668_v8 = vsel %vm547_vm4, %v3046_v6, %v534_v7  ;;  %v548_v22 = vsel %vm547_vm4, %v546_v21, %v534_v7  ;;  %vm5273_vm4 = vcmask 56320  }
 0x111   : > { %v550_v24 = vsel %vm5269_vm9, %v548_v22, %v536_v23 }
 0x112   : > { %v557_v25 = vadd.s32 4294967295, %v550_v24  ;;  %v734_v26 = vadd.s32 1, %v550_v24 }
 0x114   : > { %vm558_vm10 = vcmp.ge.s32.totalorder %v557_v25, 0  ;;  %vm559_vm11 = vcmp.le.s32.totalorder %v557_v25, 7  ;;  %vm735_vm12 = vcmp.ge.s32.totalorder %v734_v26, 0  ;;  %vm736_vm13 = vcmp.le.s32.totalorder %v734_v26, 7 }
 0x115   : > { %vm560_vm14 = vmand %vm558_vm10, %vm559_vm11  ;;  %vm575_vm10 = vcmask 31744   ;;  %vm827_vm11 = vcmask 7168  }
 0x116   : > { %vm737_vm15 = vmand %vm735_vm12, %vm736_vm13  ;;  %v561_v29 = vsel %vm560_vm14, 1, %v4440_v4  ;;  %vm5271_vm13 = vcmask 515072   ;;  %vm5270_vm14 = vcmask 465920  }
 0x117   : > { %v738_v30 = vsel %vm737_vm15, 1, %v4440_v4  ;;  %v565_v31 = vrot.slane %v561_v29, %v4707_v28  ;;  %vm5268_vm15 = vcmask 449536  }
 0x118   : > { %v742_v32 = vrot.slane %v738_v30, %v4707_v28 }
 0x119   : > { %vm4713_vm8 = vcmp.eq.s32.totalorder %v565_v31, 1 }
 0x11a   : > { %vm4724_vm12 = vcmp.eq.s32.totalorder %v742_v32, 1 }
 0x1df   : > { %v4070_v10 = vpop.f32.mrb[0].mxu0 }
 0x1e0   : > { %v4071_v11 = vpop.f32.mrb[1].mxu0 }
 0x1e1   : > { %v4676_v12 = vadd.f32 %v4071_v11, %v4070_v10 }
 0x1e3   : > { %729 = vrot.lane.b32.xlu0 %v4676_v12, %s4443_s20  ;;  %552 = vrot.lane.b32.xlu1 %v4676_v12, %s4444_s21 }
 0x1e7   : > { %569 = vrot.lane.b32.xlu0 %v4676_v12, %s4433_s29  ;;  %824 = vrot.lane.b32.xlu1 %v4676_v12, %s4445_s22 }
 0x1eb   : > { %1072 = vrot.lane.b32.xlu0 %v4676_v12, %s4446_s24  ;;  %987 = vrot.lane.b32.xlu1 %v4676_v12, %s4431_s23 }
 0x1ef   : > { %1240 = vrot.lane.b32.xlu0 %v4676_v12, %s4447_s25  ;;  %1157 = vrot.lane.b32.xlu1 %v4676_v12, %s4448_s26 }
 0x1f3   : > { %1328 = vperm.xlu1 %4420, %v1325_v13  }
 0x255   : > { %v553_v33 = vpop.permute.xlu1 %552  ;;  %v730_v34 = vpop.permute.xlu0 %729 }
 0x256   : > { %v556_v36 = vsel %vm5272_vm3, 0.0, %v553_v33  ;;  %v733_v37 = vsel %vm5273_vm4, 0.0, %v730_v34  ;;  %vm1441_vm3 = vcmask 39936   ;;  %vm3957_vm4 = vmneg %vm575_vm10 }
 0x257   : > { %v567_v39 = vsel %vm4713_vm8, %v556_v36, 0.0  ;;  %v744_v41 = vsel %vm4724_vm12, %v733_v37, 0.0  ;;  %v1335_v36 = vld [vmem:[%s5258_s8] sm:$0xff]  ;;  %v1336_v37 = vld [vmem:[%s5258_s8 + $0x8] sm:$0xff] }
 0x258   : > { %4145 = vmatpush3.msk.msra.mxu1 %vm579_vm7, %v567_v39 }
 0x259   : > { %v825_v42 = vpop.permute.xlu1 %824  ;;  %4147 = vmatmul.mubr.msk.f32.vlgmr.msra.gmra.mrb[0].mxu1 %vm575_vm10, %v568_v38  ;;  %4149 = vmatprep.subr.mxu1 %v4441_v9  ;;  %v570_v43 = vpop.permute.xlu0 %569  ;;  %v1337_v38 = vld [vmem:[%s5258_s8 + $0x10] sm:$0xff] }
 0x25a   : > { %v828_v45 = vsel %vm827_vm11, 0.0, %v825_v42  ;;  %v572_v46 = vsel %vm537_vm6, 0.0, %v570_v43  ;;  %4150 = vmatpush3.msk.msra.mxu1 %vm579_vm7, %v744_v41  ;;  %4151 = vmatprep.mubr.msk.f32.mxu1 %vm4442_vm5, %v4441_v9  ;;  %v4449_v41 = vmov 0.0|0.0   ;;  %v4333_v42 = vpack.c.bf16 %v1336_v37, %v1335_v36  ;;  %v1338_v43 = vld [vmem:[%s5258_s8 + $0x18] sm:$0xff]  ;;  %v4945_v36 = vld [vmem:[%s5253_s3 + $0x40] sm:$0xff]  ;;  %v4954_v37 = vld [vmem:[%s5253_s3 + $0x28] sm:$0xff] }
 0x25b   : > { %v829_v48 = vsel %vm4713_vm8, %v828_v45, 0.0  ;;  %4140 = vmatpush3.msk.msra.mxu0 %vm579_vm7, %v572_v46  ;;  %4154 = vmatprep.subr.mxu1 %v4441_v9  ;;  %v4336_v45 = vpack.c.bf16 %v1338_v43, %v1337_v38  ;;  %v1339_v46 = vld [vmem:[%s5258_s8 + $0x20] sm:$0xff] }
 0x25c   : > { %4142 = vmatmul.mubr.msk.f32.vlgmr.msra.gmra.mrb[2].mxu0 %vm575_vm10, %v3929_v44  ;;  %4223 = vmatprep.subr.mxu0 %v4441_v9 }
 0x25d   : > { %4152 = vmatmul.mubr.msk.f32.vlgmr.msra.gmra.mrb[2].mxu1 %vm575_vm10, %v3934_v47  ;;  %4225 = vmatprep.mubr.msk.f32.mxu0 %vm4442_vm5, %v4441_v9  ;;  %v988_v50 = vpop.permute.xlu1 %987  ;;  %v1073_v53 = vpop.permute.xlu0 %1072  ;;  %v1340_v47 = vld [vmem:[%s5258_s8 + $0x28] sm:$0xff] }
 0x25e   : > { %4155 = vmatpush3.msk.msra.mxu1 %vm579_vm7, %v829_v48  ;;  %4156 = vmatprep.mubr.msk.f32.mxu1 %vm4442_vm5, %v4441_v9  ;;  %v991_v51 = vsel %vm5271_vm13, %v988_v50, 0.0  ;;  %v1076_v55 = vsel %vm5270_vm14, %v1073_v53, 0.0  ;;  %v1341_v50 = vld [vmem:[%s5258_s8 + $0x30] sm:$0xff] }
 0x25f   : > { %4159 = vmatprep.subr.mxu1 %v4441_v9  ;;  %v992_v54 = vsel %vm4724_vm12, %v991_v51, 0.0  ;;  %v1077_v58 = vsel %vm4713_vm8, %v1076_v55, 0.0  ;;  %v1342_v51 = vld [vmem:[%s5258_s8 + $0x38] sm:$0xff] }
 0x261   : > { %4157 = vmatmul.mubr.msk.f32.vlgmr.msra.gmra.mrb[4].mxu1 %vm575_vm10, %v3937_v49  ;;  %v1158_v59 = vpop.permute.xlu1 %1157  ;;  %v1241_v61 = vpop.permute.xlu0 %1240  ;;  %v4339_v49 = vpack.c.bf16 %v1340_v47, %v1339_v46 }
 0x262   : > { %4160 = vmatpush3.msk.msra.mxu1 %vm579_vm7, %v4676_v12  ;;  %4161 = vmatprep.mubr.msk.f32.mxu1 %vm4442_vm5, %v4441_v9  ;;  %v1160_v62 = vsel %vm5269_vm9, %v1158_v59, 0.0  ;;  %v1244_v63 = vsel %vm5268_vm15, %v1241_v61, 0.0  ;;  %v4854_v61 = vld [vmem:[%s5253_s3 + $0x20] sm:$0xff] }
 0x263   : > { %4164 = vmatprep.subr.mxu1 %v4441_v9  ;;  %v1245_v1 = vsel %vm4724_vm12, %v1244_v63, 0.0  ;;  %v2182_v63 = vld [vmem:[%s5254_s4] sm:$0xff] }
 0x265   : > { %4162 = vmatmul.mubr.msk.f32.vlgmr.msra.gmra.mrb[6].mxu1 %vm575_vm10, %v3940_v52  ;;  %v4342_v52 = vpack.c.bf16 %v1342_v51, %v1341_v50 }
 0x266   : > { %4165 = vmatpush3.msk.msra.mxu1 %vm579_vm7, %v992_v54  ;;  %4166 = vmatprep.mubr.msk.f32.mxu1 %vm4442_vm5, %v4441_v9 }
 0x267   : > { %4169 = vmatprep.subr.mxu1 %v4441_v9 }
 0x269   : > { %4167 = vmatmul.mubr.msk.f32.vlgmr.msra.gmra.mrb[8].mxu1 %vm575_vm10, %v3943_v56 }
 0x26a   : > { %4170 = vmatpush3.msk.msra.mxu1 %vm579_vm7, %v1077_v58  ;;  %4171 = vmatprep.mubr.msk.f32.mxu1 %vm4442_vm5, %v4441_v9 }
 0x26b   : > { %4174 = vmatprep.subr.mxu1 %v4441_v9 }
 0x26d   : > { %4172 = vmatmul.mubr.msk.f32.vlgmr.msra.gmra.mrb[10].mxu1 %vm575_vm10, %v3946_v60 }
 0x26e   : > { %4175 = vmatpush3.msk.msra.mxu1 %vm579_vm7, %v1160_v62  ;;  %4176 = vmatprep.mubr.msk.f32.mxu1 %vm4442_vm5, %v4441_v9 }
 0x26f   : > { %4179 = vmatprep.subr.mxu1 %v4441_v9 }
 0x271   : > { %4177 = vmatmul.mubr.msk.f32.vlgmr.msra.gmra.mrb[12].mxu1 %vm575_vm10, %v3949_v0 }
 0x272   : > { %4180 = vmatpush3.msk.msra.mxu1 %vm579_vm7, %v1245_v1  ;;  %4181 = vmatprep.mubr.msk.f32.mxu1 %vm4442_vm5, %v4441_v9  ;;  %v1329_v32 = vpop.permute.xlu1 %1328 }
 0x273   : > { %4332 = vmatprep.subr.bf16.mxu1 %v4449_v41 }
 0x275   : > { %4182 = vmatmul.mubr.msk.f32.vlgmr.msra.gmra.mrb[14].mxu1 %vm575_vm10, %v3952_v2 }
 0x276   : > { %4200 = vmatprep.mubr.msk.f32.mxu1 %vm4442_vm5, %v4441_v9  ;;  %4334 = vmatpush3.bf16.msra.mxu1 %v4333_v42 }
 0x277   : > { %4335 = vmatprep.subr.bf16.mxu1 %v4449_v41 }
 0x27a   : > { %4337 = vmatpush3.bf16.msra.mxu1 %v4336_v45  ;;  %v2193_v45 = vld [vmem:[%s5259_s9 + $0x8] sm:$0xff] }
 0x27b   : > { %4338 = vmatprep.subr.bf16.mxu1 %v4449_v41 }
 0x27e   : > { %4340 = vmatpush3.bf16.msra.mxu1 %v4339_v49 }
 0x27f   : > { %4341 = vmatprep.subr.bf16.mxu1 %v4449_v41 }
 0x282   : > { %4343 = vmatpush3.bf16.msra.mxu1 %v4342_v52 }
 0x283   : > { %4203 = vmatprep.subr.mxu1 %v4441_v9 }
 0x32c   : > { %v725_v3 = vpop.f32.mrb[0].mxu1 }
 0x32d   : > { %v4148_v5 = vpop.f32.mrb[1].mxu1 }
 0x32f   : > { %v649_v6 = vpop.f32.mrb[2].mxu0 }
 0x330   : > { %v726_v7 = vadd.f32 %v725_v3, %v649_v6  ;;  %v819_v10 = vpop.f32.mrb[2].mxu1  ;;  %v4143_v11 = vpop.f32.mrb[3].mxu0 }
 0x331   : > { %v4153_v12 = vpop.f32.mrb[3].mxu1 }
 0x332   : > { %v823_v13 = vadd.f32 %v819_v10, %v726_v7 }
 0x334   : > { %v904_v15 = vpop.f32.mrb[4].mxu1 }
 0x335   : > { %v908_v16 = vadd.f32 %v904_v15, %v823_v13  ;;  %v4158_v17 = vpop.f32.mrb[5].mxu1 }
 0x338   : > { %v982_v18 = vpop.f32.mrb[6].mxu1 }
 0x339   : > { %v986_v19 = vadd.f32 %v982_v18, %v908_v16  ;;  %v4163_v20 = vpop.f32.mrb[7].mxu1 }
 0x33c   : > { %v1067_v21 = vpop.f32.mrb[8].mxu1 }
 0x33d   : > { %v1071_v22 = vadd.f32 %v1067_v21, %v986_v19  ;;  %v4168_v23 = vpop.f32.mrb[9].mxu1  ;;  %v4895_v19 = vld [vmem:[%s5253_s3] sm:$0xff] }
 0x340   : > { %v1152_v24 = vpop.f32.mrb[10].mxu1 }
 0x341   : > { %v1156_v25 = vadd.f32 %v1152_v24, %v1071_v22  ;;  %v4173_v26 = vpop.f32.mrb[11].mxu1  ;;  %v4911_v24 = vld [vmem:[%s5253_s3 + $0x10] sm:$0xff] }
 0x344   : > { %v1235_v27 = vpop.f32.mrb[12].mxu1 }
 0x345   : > { %v1239_v29 = vadd.f32 %v1235_v27, %v1156_v25  ;;  %v4178_v30 = vpop.f32.mrb[13].mxu1 }
 0x348   : > { %v1320_v31 = vpop.f32.mrb[14].mxu1 }
 0x349   : > { %v1324_v33 = vadd.f32 %v1320_v31, %v1239_v29  ;;  %v4183_v34 = vpop.f32.mrb[15].mxu1  ;;  %v4922_v29 = vld [vmem:[%s5253_s3 + $0x30] sm:$0xff]  ;;  %v4931_v31 = vld [vmem:[%s5253_s3 + $0x18] sm:$0xff] }
 0x34b   : > { %v1331_v39 = vadd.f32 %v1329_v32, %v1324_v33 }
 0x34d   : > { %v1333_v44 = vmul.f32 0.2, %v1331_v39  ;;  %vm1332_vm7 = vcmp.ge.f32.partialorder %v1331_v39, 0.0 }
 0x34f   : > { %v1334_v48 = vsel %vm1332_vm7, %v1331_v39, %v1333_v44  ;;  %vm5267_vm7 = vcmask 523264   ;;  %v4972_v39 = vld [vmem:[%s5253_s3 + $0x38] sm:$0xff]  ;;  %v2192_v44 = vld [vmem:[%s5259_s9] sm:$0xff] }
 0x350   : > { %1344 = vrot.lane.b32.xlu0 %v1334_v48, %s4431_s23  ;;  %v4345_v46 = vpack.c.bf16 %v2193_v45, %v2192_v44  ;;  %v2958_v44 = vld [vmem:[%s5260_s10 + $0x58] sm:$0xff] }
 0x354   : > { %1429 = vrot.lane.b32.xlu0 %v4648_v57, %s4450_s19 }
 0x3c2   : > { %v1345_v53 = vpop.permute.xlu0 %1344 }
 0x3c3   : > { %v1347_v54 = vsel %vm5271_vm13, %v1345_v53, 0.0 }
 0x3c4   : > { %v1348_v55 = vmax.f32 %v1334_v48, %v1347_v54 }
 0x3c6   : > { %1350 = vrot.lane.b32.xlu1 %v1348_v55, %s4448_s26  ;;  %v1430_v0 = vpop.permute.xlu0 %1429 }
 0x3c7   : > { %v1433_v1 = vsel %vm575_vm10, %v4648_v57, %v1430_v0  ;;  %vm2103_vm10 = vcmask 89088  }
 0x3c8   : > { %v1434_v3 = vsel %vm537_vm6, %v1433_v1, %v4697_v14  ;;  %v4878_v14 = vld [vmem:[%s5253_s3 + $0x8] sm:$0xff] }
 0x3ca   : > { %1431 = vrot.lane.b32.xlu1 %v4648_v57, %s4451_s14  ;;  %s4460_s14 = smov 17  }
 0x438   : > { %v1351_v56 = vpop.permute.xlu1 %1350 }
 0x439   : > { %v1353_v58 = vsel %vm5269_vm9, %v1351_v56, 0.0 }
 0x43a   : > { %v1354_v59 = vmax.f32 %v1348_v55, %v1353_v58 }
 0x43c   : > { %4201 = vmatmul.mubr.msk.f32.vlgmr.msra.gmra.mrb[16].mxu1 %vm5267_vm7, %v1354_v59  ;;  %v1432_v2 = vpop.permute.xlu1 %1431 }
 0x43d   : > { %4205 = vmatprep.mubr.msk.f32.mxu1 %vm4442_vm5, %v4441_v9  ;;  %v1436_v5 = vsel %vm1435_vm0, %v1434_v3, %v1432_v2 }
 0x43e   : > { %v1443_v6 = vadd.s32 4294967295, %v1436_v5  ;;  %v1612_v7 = vadd.s32 1, %v1436_v5 }
 0x440   : > { %vm1444_vm1 = vcmp.ge.s32.totalorder %v1443_v6, 0  ;;  %vm1445_vm7 = vcmp.le.s32.totalorder %v1443_v6, 3  ;;  %vm1613_vm9 = vcmp.ge.s32.totalorder %v1612_v7, 0  ;;  %vm1614_vm14 = vcmp.le.s32.totalorder %v1612_v7, 3 }
 0x441   : > { %vm1446_vm15 = vmand %vm1444_vm1, %vm1445_vm7  ;;  %vm5283_vm7 = vcmask 72704  }
 0x442   : > { %v1447_v10 = vsel %vm1446_vm15, 1, %v4440_v4  ;;  %vm1615_vm13 = vmand %vm1613_vm9, %vm1614_vm14  ;;  %vm1610_vm9 = vcmask 23552   ;;  %vm5282_vm15 = vcmask 56320  }
 0x443   : > { %v1451_v11 = vrot.slane %v1447_v10, %v4707_v28  ;;  %v1616_v12 = vsel %vm1615_vm13, 1, %v4440_v4  ;;  %vm1859_vm13 = vcmask 121856   ;;  %vm3983_vm14 = vmneg %vm537_vm6 }
 0x444   : > { %v1620_v18 = vrot.slane %v1616_v12, %v4707_v28 }
 0x445   : > { %vm4883_vm1 = vcmp.eq.s32.totalorder %v1451_v11, 1 }
 0x50f   : > { %v1425_v60 = vpop.f32.mrb[16].mxu1 }
 0x510   : > { %1438 = vrot.lane.b32.xlu1 %v1425_v60, %s4452_s12  ;;  %1455 = vrot.lane.b32.xlu0 %v1425_v60, %s4450_s19  ;;  %v4202_v62 = vpop.f32.mrb[17].mxu1  ;;  %s4456_s19 = smov 124   ;;  %s4463_s12 = smov 111  }
 0x511   : > { %4224 = vmatpush3.msra.mxu0 %v1425_v60 }
 0x512   : > { %4233 = vmatprep.subr.mxu0 %v4441_v9  ;;  %4226 = vmatmul.mubr.msk.f32.vlgmr.msra.gmra.mrb[4].mxu0 %vm537_vm6, %v4854_v61 }
 0x513   : > { %4235 = vmatprep.mubr.msk.f32.mxu0 %vm4442_vm5, %v4441_v9 }
 0x514   : > { %1699 = vrot.lane.b32.xlu1 %v1425_v60, %s4445_s22  ;;  %1607 = vrot.lane.b32.xlu0 %v1425_v60, %s4453_s27 }
 0x518   : > { %1938 = vrot.lane.b32.xlu1 %v1425_v60, %s4454_s30  ;;  %1856 = vrot.lane.b32.xlu0 %v1425_v60, %s4431_s23 }
 0x51c   : > { %2100 = vrot.lane.b32.xlu1 %v1425_v60, %s4455_s13  ;;  %2020 = vrot.lane.b32.xlu0 %v1425_v60, %s4456_s19  ;;  %s4457_s13 = smov 64   ;;  %s4458_s19 = smov 96  }
 0x520   : > { %2185 = vperm.xlu0 %4421, %v2182_v63  }
 0x582   : > { %v1439_v13 = vpop.permute.xlu1 %1438  ;;  %v1456_v15 = vpop.permute.xlu0 %1455 }
 0x583   : > { %v1442_v16 = vsel %vm1441_vm3, 0.0, %v1439_v13  ;;  %4204 = vmatpush3.msk.msra.mxu1 %vm3957_vm4, %v1456_v15  ;;  %vm4900_vm3 = vcmp.eq.s32.totalorder %v1620_v18, 1  ;;  %vm1941_vm4 = vcmask 105472  }
 0x584   : > { %4206 = vmatmul.mubr.msk.f32.vlgmr.msra.gmra.mrb[18].mxu1 %vm537_vm6, %v4878_v14  ;;  %4208 = vmatprep.subr.mxu1 %v4441_v9 }
 0x585   : > { %4209 = vmatpush3.msk.msra.mxu1 %vm4883_vm1, %v1442_v16  ;;  %4210 = vmatprep.mubr.msk.f32.mxu1 %vm4442_vm5, %v4441_v9 }
 0x586   : > { %v1700_v20 = vpop.permute.xlu1 %1699  ;;  %v1608_v21 = vpop.permute.xlu0 %1607  ;;  %4213 = vmatprep.subr.mxu1 %v4441_v9 }
 0x587   : > { %v1611_v22 = vsel %vm1610_vm9, 0.0, %v1608_v21  ;;  %v1702_v27 = vsel %vm827_vm11, 0.0, %v1700_v20  ;;  %vm5285_vm9 = vcmask 465920  }
 0x588   : > { %4211 = vmatmul.mubr.msk.f32.vlgmr.msra.gmra.mrb[20].mxu1 %vm537_vm6, %v4895_v19 }
 0x589   : > { %4214 = vmatpush3.msk.msra.mxu1 %vm4900_vm3, %v1611_v22  ;;  %4215 = vmatprep.mubr.msk.f32.mxu1 %vm4442_vm5, %v4441_v9 }
 0x58a   : > { %v1939_v25 = vpop.permute.xlu1 %1938  ;;  %4218 = vmatprep.subr.mxu1 %v4441_v9  ;;  %v1857_v30 = vpop.permute.xlu0 %1856 }
 0x58b   : > { %v1942_v26 = vsel %vm1941_vm4, %v1939_v25, 0.0  ;;  %v1860_v34 = vsel %vm1859_vm13, %v1857_v30, 0.0  ;;  %vm5287_vm4 = vcmask 449536  }
 0x58c   : > { %4216 = vmatmul.mubr.msk.f32.vlgmr.msra.gmra.mrb[22].mxu1 %vm537_vm6, %v4911_v24  ;;  %4234 = vmatpush3.msk.msra.mxu0 %vm4883_vm1, %v1942_v26 }
 0x58d   : > { %4219 = vmatpush3.msk.msra.mxu1 %vm4883_vm1, %v1702_v27  ;;  %4220 = vmatprep.mubr.msk.f32.mxu1 %vm4442_vm5, %v4441_v9  ;;  %vm5284_vm1 = vcmask 515072  }
 0x58e   : > { %v2101_v32 = vpop.permute.xlu1 %2100  ;;  %4228 = vmatprep.subr.mxu1 %v4441_v9  ;;  %4243 = vmatprep.subr.mxu0 %v4441_v9  ;;  %v2021_v38 = vpop.permute.xlu0 %2020 }
 0x58f   : > { %v2104_v33 = vsel %vm2103_vm10, %v2101_v32, 0.0  ;;  %4236 = vmatmul.mubr.msk.f32.vlgmr.msra.gmra.mrb[6].mxu0 %vm537_vm6, %v4922_v29  ;;  %v2949_v32 = vld [vmem:[%s5260_s10 + $0x10] sm:$0xff] }
 0x590   : > { %4221 = vmatmul.mubr.msk.f32.vlgmr.msra.gmra.mrb[24].mxu1 %vm537_vm6, %v4931_v31  ;;  %4244 = vmatpush3.msk.msra.mxu0 %vm4900_vm3, %v2104_v33 }
 0x591   : > { %4229 = vmatpush3.msk.msra.mxu1 %vm4900_vm3, %v1860_v34  ;;  %4230 = vmatprep.mubr.msk.f32.mxu1 %vm4442_vm5, %v4441_v9  ;;  %vm5286_vm3 = vcmask 457728   ;;  %v2952_v34 = vld [vmem:[%s5260_s10 + $0x28] sm:$0xff] }
 0x592   : > { %4238 = vmatprep.subr.mxu1 %v4441_v9  ;;  %4245 = vmatprep.mubr.msk.f32.mxu0 %vm4442_vm5, %v4441_v9 }
 0x593   : > { %4246 = vmatmul.mubr.msk.f32.vlgmr.msra.gmra.mrb[8].mxu0 %vm537_vm6, %v4945_v36  ;;  %4255 = vmatprep.subr.mxu0 %v4441_v9 }
 0x594   : > { %4231 = vmatmul.mubr.msk.f32.vlgmr.msra.gmra.mrb[26].mxu1 %vm537_vm6, %v4954_v37  ;;  %4257 = vmatprep.mubr.msk.f32.mxu0 %vm4442_vm5, %v4441_v9 }
 0x595   : > { %4239 = vmatpush3.msk.msra.mxu1 %vm1435_vm0, %v2021_v38  ;;  %4240 = vmatprep.mubr.msk.f32.mxu1 %vm4442_vm5, %v4441_v9  ;;  %v2951_v38 = vld [vmem:[%s5260_s10 + $0x20] sm:$0xff] }
 0x596   : > { %4344 = vmatprep.subr.bf16.mxu1 %v4449_v41 }
 0x598   : > { %4241 = vmatmul.mubr.msk.f32.vlgmr.msra.gmra.mrb[28].mxu1 %vm537_vm6, %v4972_v39 }
 0x599   : > { %4252 = vmatprep.mubr.msk.f32.mxu1 %vm4442_vm5, %v4441_v9  ;;  %4346 = vmatpush3.bf16.msra.mxu1 %v4345_v46  ;;  %v2955_v46 = vld [vmem:[%s5260_s10 + $0x40] sm:$0xff] }
 0x59a   : > { %4260 = vmatprep.subr.mxu1 %v4441_v9 }
 0x59f   : > { %v4986_v10 = vpop.permute.xlu0 %2185 }
 0x5e5   : > { %v1851_v42 = vpop.f32.mrb[4].mxu0 }
 0x5e6   : > { %v4227_v43 = vpop.f32.mrb[5].mxu0 }
 0x5e7   : > { %v2956_v43 = vld [vmem:[%s5260_s10 + $0x48] sm:$0xff] }
 0x5e8   : > { %v4355_v45 = vpack.c.bf16 %v2958_v44, %v2956_v43 }
 0x657   : > { %v1530_v41 = vpop.f32.mrb[18].mxu1 }
 0x658   : > { %v4207_v47 = vpop.f32.mrb[19].mxu1 }
 0x65b   : > { %v1603_v48 = vpop.f32.mrb[20].mxu1 }
 0x65c   : > { %v1604_v49 = vadd.f32 %v1603_v48, %v1530_v41  ;;  %v4212_v50 = vpop.f32.mrb[21].mxu1  ;;  %v2957_v41 = vld [vmem:[%s5260_s10 + $0x50] sm:$0xff]  ;;  %v2960_v48 = vld [vmem:[%s5260_s10 + $0x68] sm:$0xff] }
 0x65d   : > { %v4357_v47 = vpack.c.bf16 %v2957_v41, %v2955_v46 }
 0x65f   : > { %v1694_v51 = vpop.f32.mrb[22].mxu1 }
 0x660   : > { %v1698_v52 = vadd.f32 %v1694_v51, %v1604_v49  ;;  %v4217_v53 = vpop.f32.mrb[23].mxu1  ;;  %v2962_v49 = vld [vmem:[%s5260_s10 + $0x78] sm:$0xff]  ;;  %v2959_v51 = vld [vmem:[%s5260_s10 + $0x60] sm:$0xff] }
 0x661   : > { %v4359_v50 = vpack.c.bf16 %v2962_v49, %v2960_v48 }
 0x662   : > { %v2015_v54 = vpop.f32.mrb[6].mxu0 }
 0x663   : > { %v1775_v55 = vpop.f32.mrb[24].mxu1  ;;  %v4237_v56 = vpop.f32.mrb[7].mxu0 }
 0x664   : > { %v1779_v58 = vadd.f32 %v1775_v55, %v1698_v52  ;;  %v4222_v59 = vpop.f32.mrb[25].mxu1  ;;  %v2961_v52 = vld [vmem:[%s5260_s10 + $0x70] sm:$0xff] }
 0x665   : > { %v4361_v53 = vpack.c.bf16 %v2961_v52, %v2959_v51 }
 0x666   : > { %v1855_v60 = vadd.f32 %v1851_v42, %v1779_v58  ;;  %v2177_v62 = vpop.f32.mrb[8].mxu0 }
 0x667   : > { %v1933_v63 = vpop.f32.mrb[26].mxu1  ;;  %v4247_v0 = vpop.f32.mrb[9].mxu0 }
 0x668   : > { %v1937_v1 = vadd.f32 %v1933_v63, %v1855_v60  ;;  %v4232_v2 = vpop.f32.mrb[27].mxu1 }
 0x66a   : > { %v2019_v3 = vadd.f32 %v2015_v54, %v1937_v1 }
 0x66b   : > { %v2095_v5 = vpop.f32.mrb[28].mxu1 }
 0x66c   : > { %v2099_v6 = vadd.f32 %v2095_v5, %v2019_v3  ;;  %v4242_v7 = vpop.f32.mrb[29].mxu1 }
 0x66e   : > { %v2181_v11 = vadd.f32 %v2177_v62, %v2099_v6 }
 0x670   : > { %v2188_v12 = vadd.f32 %v4986_v10, %v2181_v11 }
 0x672   : > { %vm2189_vm0 = vcmp.ge.f32.partialorder %v2188_v12, 0.0  ;;  %v2190_v13 = vmul.f32 0.2, %v2188_v12 }
 0x674   : > { %v2191_v15 = vsel %vm2189_vm0, %v2188_v12, %v2190_v13  ;;  %vm3051_vm0 = vcmask 785408  }
 0x675   : > { %4253 = vmatmul.mubr.msk.f32.vlgmr.msra.gmra.mrb[30].mxu1 %vm539_vm2, %v2191_v15 }
 0x676   : > { %4262 = vmatprep.mubr.msk.f32.mxu1 %vm4442_vm5, %v4441_v9 }
 0x748   : > { %v2263_v16 = vpop.f32.mrb[30].mxu1 }
 0x749   : > { %2417 = vrot.lane.b32.xlu0 %v2263_v16, %s4443_s20  ;;  %2273 = vrot.lane.b32.xlu1 %v2263_v16, %s4433_s29  ;;  %v4254_v17 = vpop.f32.mrb[31].mxu1  ;;  %s4459_s29 = smov 80  }
 0x74d   : > { %2640 = vrot.lane.b32.xlu0 %v2263_v16, %s4431_s23  ;;  %2268 = vrot.lane.b32.xlu1 %v2263_v16, %s4444_s21 }
 0x751   : > { %2792 = vrot.lane.b32.xlu0 %v2263_v16, %s4448_s26  ;;  %2493 = vrot.lane.b32.xlu1 %v2263_v16, %s4445_s22  ;;  %s5289_s26 = smov 16  }
 0x755   : > { %3037 = vrot.lane.b32.xlu0 %v4648_v57, %s4457_s13  ;;  %2716 = vrot.lane.b32.xlu1 %v2263_v16, %s4446_s24 }
 0x759   : > { %2867 = vrot.lane.b32.xlu1 %v2263_v16, %s4447_s25  ;;  %3041 = vrot.lane.b32.xlu0 %v4648_v57, %s4458_s19 }
 0x75d   : > { %3039 = vrot.lane.b32.xlu1 %v4648_v57, %s4459_s29 }
 0x761   : > { %3043 = vrot.lane.b32.xlu1 %v4648_v57, %s4432_s28 }
 0x7bb   : > { %v2418_v18 = vpop.permute.xlu0 %2417  ;;  %v2274_v20 = vpop.permute.xlu1 %2273 }
 0x7bc   : > { %v2420_v21 = vsel %vm5282_vm15, 0.0, %v2418_v18  ;;  %4256 = vmatpush3.msk.msra.mxu0 %vm3983_vm14, %v2274_v20  ;;  %vm5291_vm14 = vcmask 916480  }
 0x7bd   : > { %4258 = vmatmul.mubr.msk.f32.vlgmr.msra.gmra.mrb[10].mxu0 %vm537_vm6, %v4878_v14  ;;  %4265 = vmatprep.subr.mxu0 %v4441_v9 }
 0x7be   : > { %4266 = vmatpush3.msk.msra.mxu0 %vm4724_vm12, %v2420_v21  ;;  %4267 = vmatprep.mubr.msk.f32.mxu0 %vm4442_vm5, %v4441_v9 }
 0x7bf   : > { %v2269_v22 = vpop.permute.xlu1 %2268  ;;  %4275 = vmatprep.subr.mxu0 %v4441_v9  ;;  %v2641_v14 = vpop.permute.xlu0 %2640 }
 0x7c0   : > { %v2271_v57 = vsel %vm5283_vm7, 0.0, %v2269_v22 }
 0x7c1   : > { %4261 = vmatpush3.msk.msra.mxu1 %vm4713_vm8, %v2271_v57  ;;  %4268 = vmatmul.mubr.msk.f32.vlgmr.msra.gmra.mrb[12].mxu0 %vm537_vm6, %v4911_v24 }
 0x7c2   : > { %4276 = vmatpush3.msra.mxu0 %v2263_v16  ;;  %4263 = vmatmul.mubr.msk.f32.vlgmr.msra.gmra.mrb[32].mxu1 %vm537_vm6, %v4895_v19  ;;  %v2643_v19 = vsel %vm5284_vm1, %v2641_v14, 0.0 }
 0x7c3   : > { %v2494_v23 = vpop.permute.xlu1 %2493  ;;  %4270 = vmatprep.subr.mxu1 %v4441_v9  ;;  %4272 = vmatprep.mubr.msk.f32.mxu1 %vm4442_vm5, %v4441_v9 }
 0x7c4   : > { %v2496_v25 = vsel %vm827_vm11, 0.0, %v2494_v23  ;;  %4277 = vmatprep.mubr.msk.f32.mxu0 %vm4442_vm5, %v4441_v9  ;;  %4285 = vmatprep.subr.mxu0 %v4441_v9 }
 0x7c5   : > { %4271 = vmatpush3.msk.msra.mxu1 %vm4713_vm8, %v2496_v25  ;;  %4278 = vmatmul.mubr.msk.f32.vlgmr.msra.gmra.mrb[14].mxu0 %vm537_vm6, %v4854_v61  ;;  %v2793_v61 = vpop.permute.xlu0 %2792 }
 0x7c6   : > { %4273 = vmatmul.mubr.msk.f32.vlgmr.msra.gmra.mrb[34].mxu1 %vm537_vm6, %v4931_v31  ;;  %4280 = vmatprep.subr.mxu1 %v4441_v9  ;;  %v2947_v31 = vld [vmem:[%s5260_s10] sm:$0xff] }
 0x7c7   : > { %4281 = vmatpush3.msk.msra.mxu1 %vm4724_vm12, %v2643_v19  ;;  %v2717_v24 = vpop.permute.xlu1 %2716  ;;  %4282 = vmatprep.mubr.msk.f32.mxu1 %vm4442_vm5, %v4441_v9  ;;  %v4349_v33 = vpack.c.bf16 %v2949_v32, %v2947_v31 }
 0x7c8   : > { %v2719_v26 = vsel %vm5285_vm9, %v2717_v24, 0.0  ;;  %4290 = vmatprep.subr.mxu1 %v4441_v9  ;;  %4287 = vmatprep.mubr.msk.f32.mxu0 %vm4442_vm5, %v4441_v9 }
 0x7c9   : > { %4286 = vmatpush3.msk.msra.mxu0 %vm4713_vm8, %v2719_v26  ;;  %vm5288_vm8 = vcmask 523264  }
 0x7ca   : > { %4283 = vmatmul.mubr.msk.f32.vlgmr.msra.gmra.mrb[36].mxu1 %vm537_vm6, %v4954_v37  ;;  %4288 = vmatmul.mubr.msk.f32.vlgmr.msra.gmra.mrb[16].mxu0 %vm537_vm6, %v4922_v29  ;;  %v2950_v29 = vld [vmem:[%s5260_s10 + $0x18] sm:$0xff]  ;;  %vm5290_vm10 = vmmov %vm5288_vm8 }
 0x7cb   : > { %4291 = vmatpush3.msk.msra.mxu1 %vm5286_vm3, %v2793_v61  ;;  %v2868_v27 = vpop.permute.xlu1 %2867  ;;  %4295 = vmatprep.subr.mxu0 %v4441_v9  ;;  %v4347_v40 = vpack.c.bf16 %v2950_v29, %v2948_v35  ;;  %v3038_v61 = vpop.permute.xlu0 %3037 }
 0x7cc   : > { %v2870_v30 = vsel %vm5287_vm4, %v2868_v27, 0.0  ;;  %4292 = vmatprep.mubr.msk.f32.mxu1 %vm4442_vm5, %v4441_v9  ;;  %4297 = vmatprep.mubr.msk.f32.mxu0 %vm4442_vm5, %v4441_v9  ;;  %v3048_v27 = vsel %vm5290_vm10, %v4668_v8, %v3038_v61 }
 0x7cd   : > { %4296 = vmatpush3.msk.msra.mxu0 %vm4724_vm12, %v2870_v30  ;;  %4348 = vmatprep.subr.bf16.mxu1 %v4347_v40  ;;  %vm3049_vm12 = vcmask 654336  }
 0x7ce   : > { %4293 = vmatmul.mubr.msk.f32.vlgmr.msra.gmra.mrb[38].mxu1 %vm537_vm6, %v4972_v39  ;;  %4298 = vmatmul.mubr.msk.f32.vlgmr.msra.gmra.mrb[18].mxu0 %vm537_vm6, %v4945_v36  ;;  %v2954_v36 = vld [vmem:[%s5260_s10 + $0x38] sm:$0xff]  ;;  %v2953_v39 = vld [vmem:[%s5260_s10 + $0x30] sm:$0xff] }
 0x7cf   : > { %3030 = vmatprep.mubr.f32.mxu1 %v4441_v9  ;;  %3155 = vmatprep.mubr.f32.mxu0 %v4441_v9  ;;  %v4351_v37 = vpack.c.bf16 %v2954_v36, %v2952_v34  ;;  %v4353_v42 = vpack.c.bf16 %v2953_v39, %v2951_v38  ;;  %v3040_v26 = vpop.permute.xlu1 %3039  ;;  %v3042_v35 = vpop.permute.xlu0 %3041  ;;  %v4002_v39 = vld [vmem:[%s5255_s5 + $0x4] sm:$0x7] }
 0x7d0   : > { %4350 = vmatpush1.bf16.msra.mxu1 %v4349_v33  ;;  %v3050_v30 = vsel %vm3049_vm12, %v3048_v27, %v3040_v26 }
 0x7d1   : > { %4352 = vmatprep.subr.bf16.mxu1 %v4351_v37  ;;  %v3052_v40 = vsel %vm3051_vm0, %v3050_v30, %v3042_v35  ;;  %vm5298_vm0 = vmmov %vm5291_vm14 }
 0x7d3   : > { %v3044_v29 = vpop.permute.xlu1 %3043 }
 0x7d4   : > { %4354 = vmatpush1.bf16.msra.mxu1 %v4353_v42  ;;  %v3053_v31 = vsel %vm5291_vm14, %v3052_v40, %v3044_v29  ;;  %vm3767_vm14 = vcmask 908288  }
 0x7d5   : > { %4356 = vmatprep.subr.bf16.mxu1 %v4355_v45  ;;  %v3065_v32 = vadd.s32 4294967295, %v3053_v31  ;;  %v3244_v33 = vadd.s32 1, %v3053_v31 }
 0x7d7   : > { %vm3066_vm15 = vcmp.ge.s32.totalorder %v3065_v32, 0  ;;  %vm3067_vm7 = vcmp.le.s32.totalorder %v3065_v32, 15  ;;  %vm3245_vm9 = vcmp.ge.s32.totalorder %v3244_v33, 0  ;;  %vm3246_vm3 = vcmp.le.s32.totalorder %v3244_v33, 15 }
 0x7d8   : > { %4358 = vmatpush1.bf16.msra.mxu1 %v4357_v47  ;;  %vm3068_vm1 = vmand %vm3066_vm15, %vm3067_vm7 }
 0x7d9   : > { %4360 = vmatprep.subr.bf16.mxu1 %v4359_v50  ;;  %v3069_v34 = vsel %vm3068_vm1, 1, %v4440_v4  ;;  %vm3247_vm4 = vmand %vm3245_vm9, %vm3246_vm3 }
 0x7da   : > { %v3073_v8 = vrot.slane %v3069_v34, %v4707_v28  ;;  %v3248_v42 = vsel %vm3247_vm4, 1, %v4440_v4  ;;  %vm5299_vm15 = vmmov %vm5298_vm0 }
 0x7db   : > { %v3252_v46 = vrot.slane %v3248_v42, %v4707_v28  ;;  %v3077_v28 = vld [vmem:[%s5255_s5] sm:$0x7] }
 0x7dc   : > { %4362 = vmatpush1.bf16.msra.mxu1 %v4361_v53  ;;  %vm5159_vm12 = vcmp.eq.s32.totalorder %v3073_v8, 1 }
 0x890   : > { %v2343_v54 = vpop.f32.mrb[10].mxu0 }
 0x891   : > { %v4259_v55 = vpop.f32.mrb[11].mxu0 }
 0x892   : > { %v4009_v55 = vld [vmem:[%s5255_s5 + $0x8] sm:$0x7] }
 0x894   : > { %v2488_v56 = vpop.f32.mrb[12].mxu0 }
 0x895   : > { %v2413_v58 = vpop.f32.mrb[32].mxu1  ;;  %v4269_v59 = vpop.f32.mrb[13].mxu0 }
 0x896   : > { %v2414_v60 = vadd.f32 %v2413_v58, %v2343_v54  ;;  %v4264_v62 = vpop.f32.mrb[33].mxu1  ;;  %v4013_v58 = vld [vmem:[%s5255_s5 + $0xc] sm:$0x7] }
 0x898   : > { %v2492_v63 = vadd.f32 %v2488_v56, %v2414_v60  ;;  %v2635_v0 = vpop.f32.mrb[14].mxu0 }
 0x899   : > { %v2564_v1 = vpop.f32.mrb[34].mxu1  ;;  %v4279_v2 = vpop.f32.mrb[15].mxu0 }
 0x89a   : > { %v2568_v3 = vadd.f32 %v2564_v1, %v2492_v63  ;;  %v4274_v5 = vpop.f32.mrb[35].mxu1  ;;  %v4017_v63 = vld [vmem:[%s5255_s5 + $0x10] sm:$0x7] }
 0x89b   : > { %v4019_v5 = vld [vmem:[%s5255_s5 + $0x14] sm:$0x7] }
 0x89c   : > { %v2639_v6 = vadd.f32 %v2635_v0, %v2568_v3 }
 0x89d   : > { %v2711_v7 = vpop.f32.mrb[36].mxu1  ;;  %v2787_v11 = vpop.f32.mrb[16].mxu0 }
 0x89e   : > { %v2715_v12 = vadd.f32 %v2711_v7, %v2639_v6  ;;  %v4284_v13 = vpop.f32.mrb[37].mxu1  ;;  %v4289_v15 = vpop.f32.mrb[17].mxu0 }
 0x8a0   : > { %v2791_v16 = vadd.f32 %v2787_v11, %v2715_v12  ;;  %v4023_v12 = vld [vmem:[%s5255_s5 + $0x18] sm:$0x7] }
 0x8a1   : > { %v2862_v17 = vpop.f32.mrb[38].mxu1  ;;  %v2938_v18 = vpop.f32.mrb[18].mxu0 }
 0x8a2   : > { %v2866_v20 = vadd.f32 %v2862_v17, %v2791_v16  ;;  %v4294_v21 = vpop.f32.mrb[39].mxu1  ;;  %v4299_v22 = vpop.f32.mrb[19].mxu0 }
 0x8a3   : > { %v4030_v21 = vld [vmem:[%s5255_s5 + $0x20] sm:$0x7] }
 0x8a4   : > { %v2942_v57 = vadd.f32 %v2938_v18, %v2866_v20  ;;  %v4027_v18 = vld [vmem:[%s5255_s5 + $0x1c] sm:$0x7] }
 0x8a6   : > { %v2943_v14 = vadd.f32 %v2942_v57, %v4986_v10  ;;  %v3852_v10 = vld [vmem:[%s5256_s6] sm:$0x7] }
 0x8a8   : > { %vm2944_vm5 = vcmp.ge.f32.partialorder %v2943_v14, 0.0  ;;  %v2945_v23 = vmul.f32 0.2, %v2943_v14 }
 0x8aa   : > { %v2946_v25 = vsel %vm2944_vm5, %v2943_v14, %v2945_v23  ;;  %vm4003_vm5 = vmneg %vm539_vm2 }
 0x8ab   : > { %4001 = vmatmul.mubr.msk.f32.vlgmr.msra.gmra.mrb[40].mxu1 %vm5288_vm8, %v2946_v25  ;;  %vm3060_vm8 = vcmask 138240  }
 0x97e   : > { %v5116_v19 = vpop.f32.mrb[40].mxu1 }
 0x97f   : > { %3078 = vrot.lane.b32.xlu0 %v5116_v19, %s5289_s26  ;;  %v5120_v24 = vpop.f32.mrb[41].mxu1 }
 0x980   : > { %3080 = vrot.lane.b32.xlu1 %v5120_v24, %s5289_s26 }
 0x983   : > { %3056 = vrot.lane.b32.xlu0 %v5116_v19, %s4460_s14 }
 0x984   : > { %3058 = vrot.lane.b32.xlu1 %v5120_v24, %s4460_s14 }
 0x987   : > { %3236 = vrot.lane.b32.xlu0 %v5116_v19, %s4461_s15 }
 0x988   : > { %3238 = vrot.lane.b32.xlu1 %v5120_v24, %s4461_s15 }
 0x98b   : > { %3334 = vrot.lane.b32.xlu0 %v5116_v19, %s4445_s22 }
 0x98c   : > { %3336 = vrot.lane.b32.xlu1 %v5120_v24, %s4445_s22 }
 0x98f   : > { %3502 = vrot.lane.b32.xlu0 %v5120_v24, %s4431_s23 }
 0x990   : > { %3500 = vrot.lane.b32.xlu1 %v5116_v19, %s4431_s23 }
 0x993   : > { %3590 = vrot.lane.b32.xlu0 %v5120_v24, %s4462_s16 }
 0x994   : > { %3588 = vrot.lane.b32.xlu1 %v5116_v19, %s4462_s16 }
 0x997   : > { %3677 = vrot.lane.b32.xlu0 %v5116_v19, %s4432_s28 }
 0x998   : > { %3679 = vrot.lane.b32.xlu1 %v5120_v24, %s4432_s28  ;;  %s5300_s28 = sshll.u32 %s5302_s18, 3 }
 0x999   : > { %s386_s19 = scalar_lea.vmem %s5261_s11, %s5300_s28 }
 0x99b   : > { %3765 = vrot.lane.b32.xlu0 %v5120_v24, %s4463_s12 }
 0x99c   : > { %3763 = vrot.lane.b32.xlu1 %v5116_v19, %s4463_s12 }
 0x99f   : > { %3855 = vperm.xlu0 %4421, %v3852_v10  }
 0x9f1   : > { %v3079_v36 = vpop.permute.xlu0 %3078 }
 0x9f2   : > { %v3081_v37 = vpop.permute.xlu1 %3080 }
 0x9f3   : > { %v3082_v38 = vsel %vm539_vm2, %v3079_v36, %v3081_v37  ;;  %vm5169_vm2 = vcmp.eq.s32.totalorder %v3252_v46, 1 }
 0x9f4   : > { %3091 = vmatprep.subr.mxu0 %v3082_v38 }
 0x9f5   : > { %v3057_v43 = vpop.permute.xlu0 %3056  ;;  %4004 = vmatpush1.msk.msra.mxu0 %vm4003_vm5, %v3079_v36 }
 0x9f6   : > { %4005 = vmatmul.mubr.msk.f32.vlgmr.msra.gmra.mrb[20].mxu0 %vm537_vm6, %v4002_v39  ;;  %v3059_v44 = vpop.permute.xlu1 %3058  ;;  %v3064_v47 = vsel %vm3060_vm8, 0.0, %v3057_v43 }
 0x9f7   : > { %v3061_v41 = vsel %vm3060_vm8, %v3057_v43, %v3059_v44  ;;  %3229 = vmatprep.mubr.f32.mxu0 %v4441_v9 }
 0x9f8   : > { %4006 = vmatprep.subr.msk.mxu0 %vm5159_vm12, %v3061_v41 }
 0x9f9   : > { %v3237_v4 = vpop.permute.xlu0 %3236  ;;  %4007 = vmatpush1.msk.msra.mxu0 %vm5159_vm12, %v3064_v47 }
 0x9fa   : > { %v3239_v48 = vpop.permute.xlu1 %3238  ;;  %v3243_v52 = vsel %vm1859_vm13, 0.0, %v3237_v4 }
 0x9fb   : > { %v3240_v50 = vsel %vm1859_vm13, %v3237_v4, %v3239_v48  ;;  %vm5296_vm13 = vcmask 1039360  }
 0x9fc   : > { %4010 = vmatprep.subr.msk.mxu0 %vm5169_vm2, %v3240_v50  ;;  %vm5297_vm10 = vmmov %vm5296_vm13 }
 0x9fd   : > { %v3335_v51 = vpop.permute.xlu0 %3334 }
 0x9fe   : > { %4008 = vmatmul.mubr.msk.f32.vlgmr.msra.gmra.mrb[20].mxu0 %vm537_vm6, %v3077_v28  ;;  %v3337_v53 = vpop.permute.xlu1 %3336  ;;  %v3341_v56 = vsel %vm827_vm11, 0.0, %v3335_v51 }
 0x9ff   : > { %4011 = vmatpush1.msk.msra.mxu0 %vm5169_vm2, %v3243_v52  ;;  %v3338_v54 = vsel %vm827_vm11, %v3335_v51, %v3337_v53  ;;  %3325 = vmatprep.mubr.f32.mxu0 %v4441_v9  ;;  %vm3592_vm11 = vcmask 924672  }
 0xa00   : > { %4014 = vmatprep.subr.msk.mxu0 %vm5159_vm12, %v3338_v54 }
 0xa01   : > { %v3503_v59 = vpop.permute.xlu0 %3502 }
 0xa02   : > { %v3507_v60 = vsel %vm5296_vm13, %v3503_v59, 0.0  ;;  %v3501_v62 = vpop.permute.xlu1 %3500 }
 0xa03   : > { %v3504_v1 = vsel %vm5297_vm10, %v3501_v62, %v3503_v59 }
 0xa05   : > { %v3591_v0 = vpop.permute.xlu0 %3590 }
 0xa06   : > { %4012 = vmatmul.mubr.msk.f32.vlgmr.msra.gmra.mrb[20].mxu0 %vm537_vm6, %v4009_v55  ;;  %v3596_v2 = vsel %vm3592_vm11, %v3591_v0, 0.0  ;;  %v3589_v3 = vpop.permute.xlu1 %3588 }
 0xa07   : > { %4015 = vmatpush1.msk.msra.mxu0 %vm5159_vm12, %v3341_v56  ;;  %3413 = vmatprep.mubr.f32.mxu0 %v4441_v9  ;;  %v3593_v6 = vsel %vm3592_vm11, %v3589_v3, %v3591_v0 }
 0xa08   : > { %3427 = vmatprep.subr.mxu0 %v5120_v24 }
 0xa09   : > { %v3678_v7 = vpop.permute.xlu0 %3677 }
 0xa0a   : > { %v3680_v11 = vpop.permute.xlu1 %3679 }
 0xa0b   : > { %v3681_v15 = vsel %vm5299_vm15, %v3678_v7, %v3680_v11 }
 0xa0d   : > { %v3766_v13 = vpop.permute.xlu0 %3765 }
 0xa0e   : > { %4016 = vmatmul.mubr.msk.f32.vlgmr.msra.gmra.mrb[20].mxu0 %vm537_vm6, %v4013_v58  ;;  %v3771_v16 = vsel %vm3767_vm14, %v3766_v13, 0.0  ;;  %v3764_v17 = vpop.permute.xlu1 %3763 }
 0xa0f   : > { %3428 = vmatpush1.msra.mxu0 %v5116_v19  ;;  %3491 = vmatprep.mubr.f32.mxu0 %v4441_v9  ;;  %v3768_v20 = vsel %vm3767_vm14, %v3764_v17, %v3766_v13 }
 0xa10   : > { %4020 = vmatprep.subr.msk.mxu0 %vm5169_vm2, %v3507_v60 }
 0xa16   : > { %4018 = vmatmul.mubr.msk.f32.vlgmr.msra.gmra.mrb[20].mxu0 %vm537_vm6, %v4017_v63 }
 0xa17   : > { %4021 = vmatpush1.msk.msra.mxu0 %vm5169_vm2, %v3504_v1  ;;  %3579 = vmatprep.mubr.f32.mxu0 %v4441_v9 }
 0xa18   : > { %4024 = vmatprep.subr.msk.mxu0 %vm5159_vm12, %v3596_v2 }
 0xa1e   : > { %4022 = vmatmul.mubr.msk.f32.vlgmr.msra.gmra.mrb[20].mxu0 %vm537_vm6, %v4019_v5  ;;  %v3856_v22 = vpop.permute.xlu0 %3855 }
 0xa1f   : > { %4025 = vmatpush1.msk.msra.mxu0 %vm5159_vm12, %v3593_v6  ;;  %3668 = vmatprep.mubr.f32.mxu0 %v4441_v9 }
 0xa20   : > { %4028 = vmatprep.subr.msk.mxu0 %vm5298_vm0, %v3680_v11 }
 0xa26   : > { %4026 = vmatmul.mubr.msk.f32.vlgmr.msra.gmra.mrb[20].mxu0 %vm537_vm6, %v4023_v12 }
 0xa27   : > { %3691 = vmatpush1.msra.mxu0 %v3681_v15  ;;  %3754 = vmatprep.mubr.f32.mxu0 %v4441_v9 }
 0xa28   : > { %4031 = vmatprep.subr.msk.mxu0 %vm5169_vm2, %v3771_v16 }
 0xa2e   : > { %4029 = vmatmul.mubr.msk.f32.vlgmr.msra.gmra.mrb[20].mxu0 %vm537_vm6, %v4027_v18 }
 0xa2f   : > { %4032 = vmatpush1.msk.msra.mxu0 %vm5169_vm2, %v3768_v20  ;;  %3843 = vmatprep.mubr.f32.mxu0 %v4441_v9 }
 0xa36   : > { %4033 = vmatmul.mubr.msk.f32.vlgmr.msra.gmra.mrb[20].mxu0 %vm537_vm6, %v4030_v21 }
 0xb09   : > { %v3845_v57 = vpop.f32.mrb[20].mxu0 }
 0xb0a   : > { %v3858_v14 = vadd.f32 %v3856_v22, %v3845_v57  ;;  %v3847_v23 = vpop.f32.mrb[21].mxu0 }
 0xb0b   : > { %v3859_v25 = vadd.f32 %v3856_v22, %v3847_v23 }
 0xb0d   : > { %v3862_v19 = vcombine.low %v3858_v14, %v3859_v25 }
 0xb0f   : > { %3864 = vst [vmem:[%s386_s19] sm:$0x77] %v3862_v19 }
 0xb10 PF: > { %s21_s17 = sadd.s32 1, %s4429_s17  }
 0xb11   : > { %p18_p4 = scmp.ge.s32.totalorder %s21_s17, 4  }
 0xb13   :  { %20 = sbr.rel (!%p18_p4) target bundleno = 1 (0x1), region = 118 }

</bundles_post_ra>
